<compile_context>
chip_gen: v7x
topology: tpu7x:2x2x1
jax: 0.10.0
libtpu: 0.0.40
codegen_flags: <defaults>
</compile_context>

<pallas_src>
import jax
import jax.numpy as jnp
from jax.experimental import pallas as pl
from jax.experimental.pallas import tpu as pltpu

# Make the wrapper-side fold and the pure-JAX reference use true f32 matmuls
# so the numerical comparison below is meaningful (kernel math is exact f32).
jax.config.update("jax_default_matmul_precision", "highest")

K = 10240                 # fc1 input features (fixed by the module)
H1, H2, H3, H4 = 512, 128, 16, 1

LANE = 128                # TPU lane width
DEFAULT_ROW_TILE = 128    # 128*10240*4 = 5 MiB tile; 2x-buffered fits every chip's
                          # scoped-VMEM default (v5e 16 MiB, v6e/v7x 32 MiB).


def _round_up(x, m):
    return ((x + m - 1) // m) * m


def ttc_kernel(x_ref, w_ref, b_ref, o_ref):
    """sigmoid(x @ w_eff^T + b_eff) for the collapsed (purely linear) MLP.

    x_ref: (TB, K) f32   w_ref: (1, K) f32   b_ref: (1, 1) f32   o_ref: (TB, 1) f32
    """
    k = x_ref.shape[1]
    nk = k // LANE  # K = 10240 is a multiple of 128

    # Stage 1: chunked VPU mul-accumulate over 128-lane column slices.
    # Static, lane-aligned slices -> no relayout; only one (TB, 128)
    # accumulator plus the current chunk stay live (low vreg pressure).
    acc = x_ref[:, 0:LANE] * w_ref[:, 0:LANE]
    for c in range(1, nk):
        sl = slice(c * LANE, (c + 1) * LANE)
        acc = acc + x_ref[:, sl] * w_ref[:, sl]

    # Stage 2: one cross-lane (XLU) reduction of the final 128 lanes.
    logits = jnp.sum(acc, axis=-1, keepdims=True)              # (TB, 1)
    o_ref[...] = jax.nn.sigmoid(logits + b_ref[...]).astype(o_ref.dtype)


def ttc_forward(x, folded_params, *, row_tile=DEFAULT_ROW_TILE):
    """Run the fused TTC forward pass. `folded_params` = (w_eff (1,K), b_eff (1,1))."""
    w_eff, b_eff = folded_params
    b, k = x.shape
    assert w_eff.shape == (1, k) and b_eff.shape == (1, 1)
    assert k % LANE == 0

    # Row tile: sublane-aligned, capped so the double-buffered x tile fits the
    # scoped-VMEM default on every TPU generation (incl. v5e's 16 MiB).
    tb = min(row_tile, _round_up(b, 8))
    grid = (pl.cdiv(b, tb),)

    cost = pl.CostEstimate(
        flops=2 * b * k,
        transcendentals=b,                        # one sigmoid per row
        bytes_accessed=4 * (b * k + k + b + 1),   # x + w_eff + out + b_eff (f32)
    )

    return pl.pallas_call(
        ttc_kernel,
        out_shape=jax.ShapeDtypeStruct((b, 1), jnp.float32),
        grid=grid,
        in_specs=[
            pl.BlockSpec((tb, k), lambda i: (i, 0)),   # x: one row tile per step
            pl.BlockSpec((1, k), lambda i: (0, 0)),    # w_eff: VMEM-resident
            pl.BlockSpec((1, 1), lambda i: (0, 0)),    # b_eff: VMEM-resident
        ],
        out_specs=pl.BlockSpec((tb, 1), lambda i: (i, 0)),
        compiler_params=pltpu.CompilerParams(
            # Batch-row axis is independent -> let Mosaic shard it across the
            # two TensorCores on v7x (no-op on v5e/v6e).
            dimension_semantics=("parallel",),
        ),
        cost_estimate=cost,
    )(x, w_eff, b_eff)


def make_params(key):
    """Layered params, PyTorch-Linear-style init, stored as (in, out) / (1, out)."""
    ks = jax.random.split(key, 8)

    def lin(kw, kb, fan_in, fan_out):
        lim = 1.0 / jnp.sqrt(fan_in)
        w = jax.random.uniform(kw, (fan_in, fan_out), jnp.float32, -lim, lim)
        b = jax.random.uniform(kb, (1, fan_out), jnp.float32, -lim, lim)
        return w, b

    w1, b1 = lin(ks[0], ks[1], K, H1)
    w2, b2 = lin(ks[2], ks[3], H1, H2)
    w3, b3 = lin(ks[4], ks[5], H2, H3)
    w4, b4 = lin(ks[6], ks[7], H3, H4)
    return (w1, b1, w2, b2, w3, b3, w4, b4)


def fold_params(params):
    """One-time algebraic collapse of the activation-free 4-layer MLP.

    Folded right-to-left (cheapest order, ~5 MFLOP total). Returns
    w_eff (1, K) — transposed so the kernel streams it lane-major — and
    b_eff (1, 1).
    """
    w1, b1, w2, b2, w3, b3, w4, b4 = params
    w34 = w3 @ w4                                   # (128, 1)
    w234 = w2 @ w34                                 # (512, 1)
    w_eff = (w1 @ w234).T                           # (1, K)
    b_eff = b1 @ w234 + b2 @ w34 + b3 @ w4 + b4     # (1, 1)
    return w_eff, b_eff


def ttc_reference(x, params):
    """Layer-by-layer pure-JAX reference matching the PyTorch forward exactly."""
    w1, b1, w2, b2, w3, b3, w4, b4 = params
    h = x @ w1 + b1
    h = h @ w2 + b2
    h = h @ w3 + b3
    h = h @ w4 + b4
    return jax.nn.sigmoid(h)


if __name__ == "__main__":
    key = jax.random.PRNGKey(0)
    kx, kx2, kp = jax.random.split(key, 3)

    params = make_params(kp)
    # Fold once, outside the per-call path.
    folded = fold_params(params)
    folded = tuple(jax.block_until_ready(p) for p in folded)

    # --- Small-batch check (single tile, sublane-aligned) -------------------
    B = 8
    x = jax.random.normal(kx, (B, K), jnp.float32)
    out = jax.block_until_ready(ttc_forward(x, folded))
    ref = ttc_reference(x, params)
    assert out.shape == (B, H4)
    assert jnp.allclose(out, ref, atol=5e-5, rtol=5e-5), "mismatch vs reference (B=8)"

    # --- Multi-tile check (exercises the row-tiled grid + ragged tail) ------
    B2 = 200  # -> grid of 2 row tiles of 128, tail tile partially filled
    x2 = jax.random.normal(kx2, (B2, K), jnp.float32)
    out2 = jax.block_until_ready(ttc_forward(x2, folded))
    ref2 = ttc_reference(x2, params)
    assert out2.shape == (B2, H4)
    assert jnp.allclose(out2, ref2, atol=5e-5, rtol=5e-5), "mismatch vs reference (B=200)"

    print("KERNEL_OK")
</pallas_src>

<mosaic_0001>
module attributes {stable_mosaic.version = 11 : i64} {
  func.func @ttc_kernel(%arg0: i32, %arg1: memref<8x10240xf32, #tpu.memory_space<vmem>>, %arg2: memref<1x10240xf32, #tpu.memory_space<vmem>>, %arg3: memref<1x1xf32, #tpu.memory_space<vmem>>, %arg4: memref<8x1xf32, #tpu.memory_space<vmem>>) attributes {dimension_semantics = [#tpu.dimension_semantics<parallel>], iteration_bounds = array<i64: 1>, scalar_prefetch = 0 : i64, scratch_operands = 0 : i64, tpu.core_type = #tpu.core_type<tc>, window_params = [{transform_indices = @transform_0, window_bounds = array<i64: 8, 10240>}, {pipeline_mode = #tpu.pipeline_mode<synchronous>, transform_indices = @transform_1, window_bounds = array<i64: 1, 10240>}, {pipeline_mode = #tpu.pipeline_mode<synchronous>, transform_indices = @transform_2, window_bounds = array<i64: 1, 1>}, {transform_indices = @transform_3, window_bounds = array<i64: 8, 1>}]} {
    %c0 = arith.constant 0 : index
    %c0_0 = arith.constant 0 : index
    %0 = vector.load %arg1[%c0, %c0_0] : memref<8x10240xf32, #tpu.memory_space<vmem>>, vector<8x128xf32>
    %c0_1 = arith.constant 0 : index
    %c0_2 = arith.constant 0 : index
    %1 = vector.load %arg2[%c0_1, %c0_2] : memref<1x10240xf32, #tpu.memory_space<vmem>>, vector<1x128xf32>
    %2 = vector.broadcast %1 : vector<1x128xf32> to vector<8x128xf32>
    %3 = arith.mulf %0, %2 : vector<8x128xf32>
    %c0_3 = arith.constant 0 : index
    %c128 = arith.constant 128 : index
    %4 = vector.load %arg1[%c0_3, %c128] : memref<8x10240xf32, #tpu.memory_space<vmem>>, vector<8x128xf32>
    %c0_4 = arith.constant 0 : index
    %c128_5 = arith.constant 128 : index
    %5 = vector.load %arg2[%c0_4, %c128_5] : memref<1x10240xf32, #tpu.memory_space<vmem>>, vector<1x128xf32>
    %6 = vector.broadcast %5 : vector<1x128xf32> to vector<8x128xf32>
    %7 = arith.mulf %4, %6 : vector<8x128xf32>
    %8 = arith.addf %3, %7 : vector<8x128xf32>
    %c0_6 = arith.constant 0 : index
    %c256 = arith.constant 256 : index
    %9 = vector.load %arg1[%c0_6, %c256] : memref<8x10240xf32, #tpu.memory_space<vmem>>, vector<8x128xf32>
    %c0_7 = arith.constant 0 : index
    %c256_8 = arith.constant 256 : index
    %10 = vector.load %arg2[%c0_7, %c256_8] : memref<1x10240xf32, #tpu.memory_space<vmem>>, vector<1x128xf32>
    %11 = vector.broadcast %10 : vector<1x128xf32> to vector<8x128xf32>
    %12 = arith.mulf %9, %11 : vector<8x128xf32>
    %13 = arith.addf %8, %12 : vector<8x128xf32>
    %c0_9 = arith.constant 0 : index
    %c384 = arith.constant 384 : index
    %14 = vector.load %arg1[%c0_9, %c384] : memref<8x10240xf32, #tpu.memory_space<vmem>>, vector<8x128xf32>
    %c0_10 = arith.constant 0 : index
    %c384_11 = arith.constant 384 : index
    %15 = vector.load %arg2[%c0_10, %c384_11] : memref<1x10240xf32, #tpu.memory_space<vmem>>, vector<1x128xf32>
    %16 = vector.broadcast %15 : vector<1x128xf32> to vector<8x128xf32>
    %17 = arith.mulf %14, %16 : vector<8x128xf32>
    %18 = arith.addf %13, %17 : vector<8x128xf32>
    %c0_12 = arith.constant 0 : index
    %c512 = arith.constant 512 : index
    %19 = vector.load %arg1[%c0_12, %c512] : memref<8x10240xf32, #tpu.memory_space<vmem>>, vector<8x128xf32>
    %c0_13 = arith.constant 0 : index
    %c512_14 = arith.constant 512 : index
    %20 = vector.load %arg2[%c0_13, %c512_14] : memref<1x10240xf32, #tpu.memory_space<vmem>>, vector<1x128xf32>
    %21 = vector.broadcast %20 : vector<1x128xf32> to vector<8x128xf32>
    %22 = arith.mulf %19, %21 : vector<8x128xf32>
    %23 = arith.addf %18, %22 : vector<8x128xf32>
    %c0_15 = arith.constant 0 : index
    %c640 = arith.constant 640 : index
    %24 = vector.load %arg1[%c0_15, %c640] : memref<8x10240xf32, #tpu.memory_space<vmem>>, vector<8x128xf32>
    %c0_16 = arith.constant 0 : index
    %c640_17 = arith.constant 640 : index
    %25 = vector.load %arg2[%c0_16, %c640_17] : memref<1x10240xf32, #tpu.memory_space<vmem>>, vector<1x128xf32>
    %26 = vector.broadcast %25 : vector<1x128xf32> to vector<8x128xf32>
    %27 = arith.mulf %24, %26 : vector<8x128xf32>
    %28 = arith.addf %23, %27 : vector<8x128xf32>
    %c0_18 = arith.constant 0 : index
    %c768 = arith.constant 768 : index
    %29 = vector.load %arg1[%c0_18, %c768] : memref<8x10240xf32, #tpu.memory_space<vmem>>, vector<8x128xf32>
    %c0_19 = arith.constant 0 : index
    %c768_20 = arith.constant 768 : index
    %30 = vector.load %arg2[%c0_19, %c768_20] : memref<1x10240xf32, #tpu.memory_space<vmem>>, vector<1x128xf32>
    %31 = vector.broadcast %30 : vector<1x128xf32> to vector<8x128xf32>
    %32 = arith.mulf %29, %31 : vector<8x128xf32>
    %33 = arith.addf %28, %32 : vector<8x128xf32>
    %c0_21 = arith.constant 0 : index
    %c896 = arith.constant 896 : index
    %34 = vector.load %arg1[%c0_21, %c896] : memref<8x10240xf32, #tpu.memory_space<vmem>>, vector<8x128xf32>
    %c0_22 = arith.constant 0 : index
    %c896_23 = arith.constant 896 : index
    %35 = vector.load %arg2[%c0_22, %c896_23] : memref<1x10240xf32, #tpu.memory_space<vmem>>, vector<1x128xf32>
    %36 = vector.broadcast %35 : vector<1x128xf32> to vector<8x128xf32>
    %37 = arith.mulf %34, %36 : vector<8x128xf32>
    %38 = arith.addf %33, %37 : vector<8x128xf32>
    %c0_24 = arith.constant 0 : index
    %c1024 = arith.constant 1024 : index
    %39 = vector.load %arg1[%c0_24, %c1024] : memref<8x10240xf32, #tpu.memory_space<vmem>>, vector<8x128xf32>
    %c0_25 = arith.constant 0 : index
    %c1024_26 = arith.constant 1024 : index
    %40 = vector.load %arg2[%c0_25, %c1024_26] : memref<1x10240xf32, #tpu.memory_space<vmem>>, vector<1x128xf32>
    %41 = vector.broadcast %40 : vector<1x128xf32> to vector<8x128xf32>
    %42 = arith.mulf %39, %41 : vector<8x128xf32>
    %43 = arith.addf %38, %42 : vector<8x128xf32>
    %c0_27 = arith.constant 0 : index
    %c1152 = arith.constant 1152 : index
    %44 = vector.load %arg1[%c0_27, %c1152] : memref<8x10240xf32, #tpu.memory_space<vmem>>, vector<8x128xf32>
    %c0_28 = arith.constant 0 : index
    %c1152_29 = arith.constant 1152 : index
    %45 = vector.load %arg2[%c0_28, %c1152_29] : memref<1x10240xf32, #tpu.memory_space<vmem>>, vector<1x128xf32>
    %46 = vector.broadcast %45 : vector<1x128xf32> to vector<8x128xf32>
    %47 = arith.mulf %44, %46 : vector<8x128xf32>
    %48 = arith.addf %43, %47 : vector<8x128xf32>
    %c0_30 = arith.constant 0 : index
    %c1280 = arith.constant 1280 : index
    %49 = vector.load %arg1[%c0_30, %c1280] : memref<8x10240xf32, #tpu.memory_space<vmem>>, vector<8x128xf32>
    %c0_31 = arith.constant 0 : index
    %c1280_32 = arith.constant 1280 : index
    %50 = vector.load %arg2[%c0_31, %c1280_32] : memref<1x10240xf32, #tpu.memory_space<vmem>>, vector<1x128xf32>
    %51 = vector.broadcast %50 : vector<1x128xf32> to vector<8x128xf32>
    %52 = arith.mulf %49, %51 : vector<8x128xf32>
    %53 = arith.addf %48, %52 : vector<8x128xf32>
    %c0_33 = arith.constant 0 : index
    %c1408 = arith.constant 1408 : index
    %54 = vector.load %arg1[%c0_33, %c1408] : memref<8x10240xf32, #tpu.memory_space<vmem>>, vector<8x128xf32>
    %c0_34 = arith.constant 0 : index
    %c1408_35 = arith.constant 1408 : index
    %55 = vector.load %arg2[%c0_34, %c1408_35] : memref<1x10240xf32, #tpu.memory_space<vmem>>, vector<1x128xf32>
    %56 = vector.broadcast %55 : vector<1x128xf32> to vector<8x128xf32>
    %57 = arith.mulf %54, %56 : vector<8x128xf32>
    %58 = arith.addf %53, %57 : vector<8x128xf32>
    %c0_36 = arith.constant 0 : index
    %c1536 = arith.constant 1536 : index
    %59 = vector.load %arg1[%c0_36, %c1536] : memref<8x10240xf32, #tpu.memory_space<vmem>>, vector<8x128xf32>
    %c0_37 = arith.constant 0 : index
    %c1536_38 = arith.constant 1536 : index
    %60 = vector.load %arg2[%c0_37, %c1536_38] : memref<1x10240xf32, #tpu.memory_space<vmem>>, vector<1x128xf32>
    %61 = vector.broadcast %60 : vector<1x128xf32> to vector<8x128xf32>
    %62 = arith.mulf %59, %61 : vector<8x128xf32>
    %63 = arith.addf %58, %62 : vector<8x128xf32>
    %c0_39 = arith.constant 0 : index
    %c1664 = arith.constant 1664 : index
    %64 = vector.load %arg1[%c0_39, %c1664] : memref<8x10240xf32, #tpu.memory_space<vmem>>, vector<8x128xf32>
    %c0_40 = arith.constant 0 : index
    %c1664_41 = arith.constant 1664 : index
    %65 = vector.load %arg2[%c0_40, %c1664_41] : memref<1x10240xf32, #tpu.memory_space<vmem>>, vector<1x128xf32>
    %66 = vector.broadcast %65 : vector<1x128xf32> to vector<8x128xf32>
    %67 = arith.mulf %64, %66 : vector<8x128xf32>
    %68 = arith.addf %63, %67 : vector<8x128xf32>
    %c0_42 = arith.constant 0 : index
    %c1792 = arith.constant 1792 : index
    %69 = vector.load %arg1[%c0_42, %c1792] : memref<8x10240xf32, #tpu.memory_space<vmem>>, vector<8x128xf32>
    %c0_43 = arith.constant 0 : index
    %c1792_44 = arith.constant 1792 : index
    %70 = vector.load %arg2[%c0_43, %c1792_44] : memref<1x10240xf32, #tpu.memory_space<vmem>>, vector<1x128xf32>
    %71 = vector.broadcast %70 : vector<1x128xf32> to vector<8x128xf32>
    %72 = arith.mulf %69, %71 : vector<8x128xf32>
    %73 = arith.addf %68, %72 : vector<8x128xf32>
    %c0_45 = arith.constant 0 : index
    %c1920 = arith.constant 1920 : index
    %74 = vector.load %arg1[%c0_45, %c1920] : memref<8x10240xf32, #tpu.memory_space<vmem>>, vector<8x128xf32>
    %c0_46 = arith.constant 0 : index
    %c1920_47 = arith.constant 1920 : index
    %75 = vector.load %arg2[%c0_46, %c1920_47] : memref<1x10240xf32, #tpu.memory_space<vmem>>, vector<1x128xf32>
    %76 = vector.broadcast %75 : vector<1x128xf32> to vector<8x128xf32>
    %77 = arith.mulf %74, %76 : vector<8x128xf32>
    %78 = arith.addf %73, %77 : vector<8x128xf32>
    %c0_48 = arith.constant 0 : index
    %c2048 = arith.constant 2048 : index
    %79 = vector.load %arg1[%c0_48, %c2048] : memref<8x10240xf32, #tpu.memory_space<vmem>>, vector<8x128xf32>
    %c0_49 = arith.constant 0 : index
    %c2048_50 = arith.constant 2048 : index
    %80 = vector.load %arg2[%c0_49, %c2048_50] : memref<1x10240xf32, #tpu.memory_space<vmem>>, vector<1x128xf32>
    %81 = vector.broadcast %80 : vector<1x128xf32> to vector<8x128xf32>
    %82 = arith.mulf %79, %81 : vector<8x128xf32>
    %83 = arith.addf %78, %82 : vector<8x128xf32>
    %c0_51 = arith.constant 0 : index
    %c2176 = arith.constant 2176 : index
    %84 = vector.load %arg1[%c0_51, %c2176] : memref<8x10240xf32, #tpu.memory_space<vmem>>, vector<8x128xf32>
    %c0_52 = arith.constant 0 : index
    %c2176_53 = arith.constant 2176 : index
    %85 = vector.load %arg2[%c0_52, %c2176_53] : memref<1x10240xf32, #tpu.memory_space<vmem>>, vector<1x128xf32>
    %86 = vector.broadcast %85 : vector<1x128xf32> to vector<8x128xf32>
    %87 = arith.mulf %84, %86 : vector<8x128xf32>
    %88 = arith.addf %83, %87 : vector<8x128xf32>
    %c0_54 = arith.constant 0 : index
    %c2304 = arith.constant 2304 : index
    %89 = vector.load %arg1[%c0_54, %c2304] : memref<8x10240xf32, #tpu.memory_space<vmem>>, vector<8x128xf32>
    %c0_55 = arith.constant 0 : index
    %c2304_56 = arith.constant 2304 : index
    %90 = vector.load %arg2[%c0_55, %c2304_56] : memref<1x10240xf32, #tpu.memory_space<vmem>>, vector<1x128xf32>
    %91 = vector.broadcast %90 : vector<1x128xf32> to vector<8x128xf32>
    %92 = arith.mulf %89, %91 : vector<8x128xf32>
    %93 = arith.addf %88, %92 : vector<8x128xf32>
    %c0_57 = arith.constant 0 : index
    %c2432 = arith.constant 2432 : index
    %94 = vector.load %arg1[%c0_57, %c2432] : memref<8x10240xf32, #tpu.memory_space<vmem>>, vector<8x128xf32>
    %c0_58 = arith.constant 0 : index
    %c2432_59 = arith.constant 2432 : index
    %95 = vector.load %arg2[%c0_58, %c2432_59] : memref<1x10240xf32, #tpu.memory_space<vmem>>, vector<1x128xf32>
    %96 = vector.broadcast %95 : vector<1x128xf32> to vector<8x128xf32>
    %97 = arith.mulf %94, %96 : vector<8x128xf32>
    %98 = arith.addf %93, %97 : vector<8x128xf32>
    %c0_60 = arith.constant 0 : index
    %c2560 = arith.constant 2560 : index
    %99 = vector.load %arg1[%c0_60, %c2560] : memref<8x10240xf32, #tpu.memory_space<vmem>>, vector<8x128xf32>
    %c0_61 = arith.constant 0 : index
    %c2560_62 = arith.constant 2560 : index
    %100 = vector.load %arg2[%c0_61, %c2560_62] : memref<1x10240xf32, #tpu.memory_space<vmem>>, vector<1x128xf32>
    %101 = vector.broadcast %100 : vector<1x128xf32> to vector<8x128xf32>
    %102 = arith.mulf %99, %101 : vector<8x128xf32>
    %103 = arith.addf %98, %102 : vector<8x128xf32>
    %c0_63 = arith.constant 0 : index
    %c2688 = arith.constant 2688 : index
    %104 = vector.load %arg1[%c0_63, %c2688] : memref<8x10240xf32, #tpu.memory_space<vmem>>, vector<8x128xf32>
    %c0_64 = arith.constant 0 : index
    %c2688_65 = arith.constant 2688 : index
    %105 = vector.load %arg2[%c0_64, %c2688_65] : memref<1x10240xf32, #tpu.memory_space<vmem>>, vector<1x128xf32>
    %106 = vector.broadcast %105 : vector<1x128xf32> to vector<8x128xf32>
    %107 = arith.mulf %104, %106 : vector<8x128xf32>
    %108 = arith.addf %103, %107 : vector<8x128xf32>
    %c0_66 = arith.constant 0 : index
    %c2816 = arith.constant 2816 : index
    %109 = vector.load %arg1[%c0_66, %c2816] : memref<8x10240xf32, #tpu.memory_space<vmem>>, vector<8x128xf32>
    %c0_67 = arith.constant 0 : index
    %c2816_68 = arith.constant 2816 : index
    %110 = vector.load %arg2[%c0_67, %c2816_68] : memref<1x10240xf32, #tpu.memory_space<vmem>>, vector<1x128xf32>
    %111 = vector.broadcast %110 : vector<1x128xf32> to vector<8x128xf32>
    %112 = arith.mulf %109, %111 : vector<8x128xf32>
    %113 = arith.addf %108, %112 : vector<8x128xf32>
    %c0_69 = arith.constant 0 : index
    %c2944 = arith.constant 2944 : index
    %114 = vector.load %arg1[%c0_69, %c2944] : memref<8x10240xf32, #tpu.memory_space<vmem>>, vector<8x128xf32>
    %c0_70 = arith.constant 0 : index
    %c2944_71 = arith.constant 2944 : index
    %115 = vector.load %arg2[%c0_70, %c2944_71] : memref<1x10240xf32, #tpu.memory_space<vmem>>, vector<1x128xf32>
    %116 = vector.broadcast %115 : vector<1x128xf32> to vector<8x128xf32>
    %117 = arith.mulf %114, %116 : vector<8x128xf32>
    %118 = arith.addf %113, %117 : vector<8x128xf32>
    %c0_72 = arith.constant 0 : index
    %c3072 = arith.constant 3072 : index
    %119 = vector.load %arg1[%c0_72, %c3072] : memref<8x10240xf32, #tpu.memory_space<vmem>>, vector<8x128xf32>
    %c0_73 = arith.constant 0 : index
    %c3072_74 = arith.constant 3072 : index
    %120 = vector.load %arg2[%c0_73, %c3072_74] : memref<1x10240xf32, #tpu.memory_space<vmem>>, vector<1x128xf32>
    %121 = vector.broadcast %120 : vector<1x128xf32> to vector<8x128xf32>
    %122 = arith.mulf %119, %121 : vector<8x128xf32>
    %123 = arith.addf %118, %122 : vector<8x128xf32>
    %c0_75 = arith.constant 0 : index
    %c3200 = arith.constant 3200 : index
    %124 = vector.load %arg1[%c0_75, %c3200] : memref<8x10240xf32, #tpu.memory_space<vmem>>, vector<8x128xf32>
    %c0_76 = arith.constant 0 : index
    %c3200_77 = arith.constant 3200 : index
    %125 = vector.load %arg2[%c0_76, %c3200_77] : memref<1x10240xf32, #tpu.memory_space<vmem>>, vector<1x128xf32>
    %126 = vector.broadcast %125 : vector<1x128xf32> to vector<8x128xf32>
    %127 = arith.mulf %124, %126 : vector<8x128xf32>
    %128 = arith.addf %123, %127 : vector<8x128xf32>
    %c0_78 = arith.constant 0 : index
    %c3328 = arith.constant 3328 : index
    %129 = vector.load %arg1[%c0_78, %c3328] : memref<8x10240xf32, #tpu.memory_space<vmem>>, vector<8x128xf32>
    %c0_79 = arith.constant 0 : index
    %c3328_80 = arith.constant 3328 : index
    %130 = vector.load %arg2[%c0_79, %c3328_80] : memref<1x10240xf32, #tpu.memory_space<vmem>>, vector<1x128xf32>
    %131 = vector.broadcast %130 : vector<1x128xf32> to vector<8x128xf32>
    %132 = arith.mulf %129, %131 : vector<8x128xf32>
    %133 = arith.addf %128, %132 : vector<8x128xf32>
    %c0_81 = arith.constant 0 : index
    %c3456 = arith.constant 3456 : index
    %134 = vector.load %arg1[%c0_81, %c3456] : memref<8x10240xf32, #tpu.memory_space<vmem>>, vector<8x128xf32>
    %c0_82 = arith.constant 0 : index
    %c3456_83 = arith.constant 3456 : index
    %135 = vector.load %arg2[%c0_82, %c3456_83] : memref<1x10240xf32, #tpu.memory_space<vmem>>, vector<1x128xf32>
    %136 = vector.broadcast %135 : vector<1x128xf32> to vector<8x128xf32>
    %137 = arith.mulf %134, %136 : vector<8x128xf32>
    %138 = arith.addf %133, %137 : vector<8x128xf32>
    %c0_84 = arith.constant 0 : index
    %c3584 = arith.constant 3584 : index
    %139 = vector.load %arg1[%c0_84, %c3584] : memref<8x10240xf32, #tpu.memory_space<vmem>>, vector<8x128xf32>
    %c0_85 = arith.constant 0 : index
    %c3584_86 = arith.constant 3584 : index
    %140 = vector.load %arg2[%c0_85, %c3584_86] : memref<1x10240xf32, #tpu.memory_space<vmem>>, vector<1x128xf32>
    %141 = vector.broadcast %140 : vector<1x128xf32> to vector<8x128xf32>
    %142 = arith.mulf %139, %141 : vector<8x128xf32>
    %143 = arith.addf %138, %142 : vector<8x128xf32>
    %c0_87 = arith.constant 0 : index
    %c3712 = arith.constant 3712 : index
    %144 = vector.load %arg1[%c0_87, %c3712] : memref<8x10240xf32, #tpu.memory_space<vmem>>, vector<8x128xf32>
    %c0_88 = arith.constant 0 : index
    %c3712_89 = arith.constant 3712 : index
    %145 = vector.load %arg2[%c0_88, %c3712_89] : memref<1x10240xf32, #tpu.memory_space<vmem>>, vector<1x128xf32>
    %146 = vector.broadcast %145 : vector<1x128xf32> to vector<8x128xf32>
    %147 = arith.mulf %144, %146 : vector<8x128xf32>
    %148 = arith.addf %143, %147 : vector<8x128xf32>
    %c0_90 = arith.constant 0 : index
    %c3840 = arith.constant 3840 : index
    %149 = vector.load %arg1[%c0_90, %c3840] : memref<8x10240xf32, #tpu.memory_space<vmem>>, vector<8x128xf32>
    %c0_91 = arith.constant 0 : index
    %c3840_92 = arith.constant 3840 : index
    %150 = vector.load %arg2[%c0_91, %c3840_92] : memref<1x10240xf32, #tpu.memory_space<vmem>>, vector<1x128xf32>
    %151 = vector.broadcast %150 : vector<1x128xf32> to vector<8x128xf32>
    %152 = arith.mulf %149, %151 : vector<8x128xf32>
    %153 = arith.addf %148, %152 : vector<8x128xf32>
    %c0_93 = arith.constant 0 : index
    %c3968 = arith.constant 3968 : index
    %154 = vector.load %arg1[%c0_93, %c3968] : memref<8x10240xf32, #tpu.memory_space<vmem>>, vector<8x128xf32>
    %c0_94 = arith.constant 0 : index
    %c3968_95 = arith.constant 3968 : index
    %155 = vector.load %arg2[%c0_94, %c3968_95] : memref<1x10240xf32, #tpu.memory_space<vmem>>, vector<1x128xf32>
    %156 = vector.broadcast %155 : vector<1x128xf32> to vector<8x128xf32>
    %157 = arith.mulf %154, %156 : vector<8x128xf32>
    %158 = arith.addf %153, %157 : vector<8x128xf32>
    %c0_96 = arith.constant 0 : index
    %c4096 = arith.constant 4096 : index
    %159 = vector.load %arg1[%c0_96, %c4096] : memref<8x10240xf32, #tpu.memory_space<vmem>>, vector<8x128xf32>
    %c0_97 = arith.constant 0 : index
    %c4096_98 = arith.constant 4096 : index
    %160 = vector.load %arg2[%c0_97, %c4096_98] : memref<1x10240xf32, #tpu.memory_space<vmem>>, vector<1x128xf32>
    %161 = vector.broadcast %160 : vector<1x128xf32> to vector<8x128xf32>
    %162 = arith.mulf %159, %161 : vector<8x128xf32>
    %163 = arith.addf %158, %162 : vector<8x128xf32>
    %c0_99 = arith.constant 0 : index
    %c4224 = arith.constant 4224 : index
    %164 = vector.load %arg1[%c0_99, %c4224] : memref<8x10240xf32, #tpu.memory_space<vmem>>, vector<8x128xf32>
    %c0_100 = arith.constant 0 : index
    %c4224_101 = arith.constant 4224 : index
    %165 = vector.load %arg2[%c0_100, %c4224_101] : memref<1x10240xf32, #tpu.memory_space<vmem>>, vector<1x128xf32>
    %166 = vector.broadcast %165 : vector<1x128xf32> to vector<8x128xf32>
    %167 = arith.mulf %164, %166 : vector<8x128xf32>
    %168 = arith.addf %163, %167 : vector<8x128xf32>
    %c0_102 = arith.constant 0 : index
    %c4352 = arith.constant 4352 : index
    %169 = vector.load %arg1[%c0_102, %c4352] : memref<8x10240xf32, #tpu.memory_space<vmem>>, vector<8x128xf32>
    %c0_103 = arith.constant 0 : index
    %c4352_104 = arith.constant 4352 : index
    %170 = vector.load %arg2[%c0_103, %c4352_104] : memref<1x10240xf32, #tpu.memory_space<vmem>>, vector<1x128xf32>
    %171 = vector.broadcast %170 : vector<1x128xf32> to vector<8x128xf32>
    %172 = arith.mulf %169, %171 : vector<8x128xf32>
    %173 = arith.addf %168, %172 : vector<8x128xf32>
    %c0_105 = arith.constant 0 : index
    %c4480 = arith.constant 4480 : index
    %174 = vector.load %arg1[%c0_105, %c4480] : memref<8x10240xf32, #tpu.memory_space<vmem>>, vector<8x128xf32>
    %c0_106 = arith.constant 0 : index
    %c4480_107 = arith.constant 4480 : index
    %175 = vector.load %arg2[%c0_106, %c4480_107] : memref<1x10240xf32, #tpu.memory_space<vmem>>, vector<1x128xf32>
    %176 = vector.broadcast %175 : vector<1x128xf32> to vector<8x128xf32>
    %177 = arith.mulf %174, %176 : vector<8x128xf32>
    %178 = arith.addf %173, %177 : vector<8x128xf32>
    %c0_108 = arith.constant 0 : index
    %c4608 = arith.constant 4608 : index
    %179 = vector.load %arg1[%c0_108, %c4608] : memref<8x10240xf32, #tpu.memory_space<vmem>>, vector<8x128xf32>
    %c0_109 = arith.constant 0 : index
    %c4608_110 = arith.constant 4608 : index
    %180 = vector.load %arg2[%c0_109, %c4608_110] : memref<1x10240xf32, #tpu.memory_space<vmem>>, vector<1x128xf32>
    %181 = vector.broadcast %180 : vector<1x128xf32> to vector<8x128xf32>
    %182 = arith.mulf %179, %181 : vector<8x128xf32>
    %183 = arith.addf %178, %182 : vector<8x128xf32>
    %c0_111 = arith.constant 0 : index
    %c4736 = arith.constant 4736 : index
    %184 = vector.load %arg1[%c0_111, %c4736] : memref<8x10240xf32, #tpu.memory_space<vmem>>, vector<8x128xf32>
    %c0_112 = arith.constant 0 : index
    %c4736_113 = arith.constant 4736 : index
    %185 = vector.load %arg2[%c0_112, %c4736_113] : memref<1x10240xf32, #tpu.memory_space<vmem>>, vector<1x128xf32>
    %186 = vector.broadcast %185 : vector<1x128xf32> to vector<8x128xf32>
    %187 = arith.mulf %184, %186 : vector<8x128xf32>
    %188 = arith.addf %183, %187 : vector<8x128xf32>
    %c0_114 = arith.constant 0 : index
    %c4864 = arith.constant 4864 : index
    %189 = vector.load %arg1[%c0_114, %c4864] : memref<8x10240xf32, #tpu.memory_space<vmem>>, vector<8x128xf32>
    %c0_115 = arith.constant 0 : index
    %c4864_116 = arith.constant 4864 : index
    %190 = vector.load %arg2[%c0_115, %c4864_116] : memref<1x10240xf32, #tpu.memory_space<vmem>>, vector<1x128xf32>
    %191 = vector.broadcast %190 : vector<1x128xf32> to vector<8x128xf32>
    %192 = arith.mulf %189, %191 : vector<8x128xf32>
    %193 = arith.addf %188, %192 : vector<8x128xf32>
    %c0_117 = arith.constant 0 : index
    %c4992 = arith.constant 4992 : index
    %194 = vector.load %arg1[%c0_117, %c4992] : memref<8x10240xf32, #tpu.memory_space<vmem>>, vector<8x128xf32>
    %c0_118 = arith.constant 0 : index
    %c4992_119 = arith.constant 4992 : index
    %195 = vector.load %arg2[%c0_118, %c4992_119] : memref<1x10240xf32, #tpu.memory_space<vmem>>, vector<1x128xf32>
    %196 = vector.broadcast %195 : vector<1x128xf32> to vector<8x128xf32>
    %197 = arith.mulf %194, %196 : vector<8x128xf32>
    %198 = arith.addf %193, %197 : vector<8x128xf32>
    %c0_120 = arith.constant 0 : index
    %c5120 = arith.constant 5120 : index
    %199 = vector.load %arg1[%c0_120, %c5120] : memref<8x10240xf32, #tpu.memory_space<vmem>>, vector<8x128xf32>
    %c0_121 = arith.constant 0 : index
    %c5120_122 = arith.constant 5120 : index
    %200 = vector.load %arg2[%c0_121, %c5120_122] : memref<1x10240xf32, #tpu.memory_space<vmem>>, vector<1x128xf32>
    %201 = vector.broadcast %200 : vector<1x128xf32> to vector<8x128xf32>
    %202 = arith.mulf %199, %201 : vector<8x128xf32>
    %203 = arith.addf %198, %202 : vector<8x128xf32>
    %c0_123 = arith.constant 0 : index
    %c5248 = arith.constant 5248 : index
    %204 = vector.load %arg1[%c0_123, %c5248] : memref<8x10240xf32, #tpu.memory_space<vmem>>, vector<8x128xf32>
    %c0_124 = arith.constant 0 : index
    %c5248_125 = arith.constant 5248 : index
    %205 = vector.load %arg2[%c0_124, %c5248_125] : memref<1x10240xf32, #tpu.memory_space<vmem>>, vector<1x128xf32>
    %206 = vector.broadcast %205 : vector<1x128xf32> to vector<8x128xf32>
    %207 = arith.mulf %204, %206 : vector<8x128xf32>
    %208 = arith.addf %203, %207 : vector<8x128xf32>
    %c0_126 = arith.constant 0 : index
    %c5376 = arith.constant 5376 : index
    %209 = vector.load %arg1[%c0_126, %c5376] : memref<8x10240xf32, #tpu.memory_space<vmem>>, vector<8x128xf32>
    %c0_127 = arith.constant 0 : index
    %c5376_128 = arith.constant 5376 : index
    %210 = vector.load %arg2[%c0_127, %c5376_128] : memref<1x10240xf32, #tpu.memory_space<vmem>>, vector<1x128xf32>
    %211 = vector.broadcast %210 : vector<1x128xf32> to vector<8x128xf32>
    %212 = arith.mulf %209, %211 : vector<8x128xf32>
    %213 = arith.addf %208, %212 : vector<8x128xf32>
    %c0_129 = arith.constant 0 : index
    %c5504 = arith.constant 5504 : index
    %214 = vector.load %arg1[%c0_129, %c5504] : memref<8x10240xf32, #tpu.memory_space<vmem>>, vector<8x128xf32>
    %c0_130 = arith.constant 0 : index
    %c5504_131 = arith.constant 5504 : index
    %215 = vector.load %arg2[%c0_130, %c5504_131] : memref<1x10240xf32, #tpu.memory_space<vmem>>, vector<1x128xf32>
    %216 = vector.broadcast %215 : vector<1x128xf32> to vector<8x128xf32>
    %217 = arith.mulf %214, %216 : vector<8x128xf32>
    %218 = arith.addf %213, %217 : vector<8x128xf32>
    %c0_132 = arith.constant 0 : index
    %c5632 = arith.constant 5632 : index
    %219 = vector.load %arg1[%c0_132, %c5632] : memref<8x10240xf32, #tpu.memory_space<vmem>>, vector<8x128xf32>
    %c0_133 = arith.constant 0 : index
    %c5632_134 = arith.constant 5632 : index
    %220 = vector.load %arg2[%c0_133, %c5632_134] : memref<1x10240xf32, #tpu.memory_space<vmem>>, vector<1x128xf32>
    %221 = vector.broadcast %220 : vector<1x128xf32> to vector<8x128xf32>
    %222 = arith.mulf %219, %221 : vector<8x128xf32>
    %223 = arith.addf %218, %222 : vector<8x128xf32>
    %c0_135 = arith.constant 0 : index
    %c5760 = arith.constant 5760 : index
    %224 = vector.load %arg1[%c0_135, %c5760] : memref<8x10240xf32, #tpu.memory_space<vmem>>, vector<8x128xf32>
    %c0_136 = arith.constant 0 : index
    %c5760_137 = arith.constant 5760 : index
    %225 = vector.load %arg2[%c0_136, %c5760_137] : memref<1x10240xf32, #tpu.memory_space<vmem>>, vector<1x128xf32>
    %226 = vector.broadcast %225 : vector<1x128xf32> to vector<8x128xf32>
    %227 = arith.mulf %224, %226 : vector<8x128xf32>
    %228 = arith.addf %223, %227 : vector<8x128xf32>
    %c0_138 = arith.constant 0 : index
    %c5888 = arith.constant 5888 : index
    %229 = vector.load %arg1[%c0_138, %c5888] : memref<8x10240xf32, #tpu.memory_space<vmem>>, vector<8x128xf32>
    %c0_139 = arith.constant 0 : index
    %c5888_140 = arith.constant 5888 : index
    %230 = vector.load %arg2[%c0_139, %c5888_140] : memref<1x10240xf32, #tpu.memory_space<vmem>>, vector<1x128xf32>
    %231 = vector.broadcast %230 : vector<1x128xf32> to vector<8x128xf32>
    %232 = arith.mulf %229, %231 : vector<8x128xf32>
    %233 = arith.addf %228, %232 : vector<8x128xf32>
    %c0_141 = arith.constant 0 : index
    %c6016 = arith.constant 6016 : index
    %234 = vector.load %arg1[%c0_141, %c6016] : memref<8x10240xf32, #tpu.memory_space<vmem>>, vector<8x128xf32>
    %c0_142 = arith.constant 0 : index
    %c6016_143 = arith.constant 6016 : index
    %235 = vector.load %arg2[%c0_142, %c6016_143] : memref<1x10240xf32, #tpu.memory_space<vmem>>, vector<1x128xf32>
    %236 = vector.broadcast %235 : vector<1x128xf32> to vector<8x128xf32>
    %237 = arith.mulf %234, %236 : vector<8x128xf32>
    %238 = arith.addf %233, %237 : vector<8x128xf32>
    %c0_144 = arith.constant 0 : index
    %c6144 = arith.constant 6144 : index
    %239 = vector.load %arg1[%c0_144, %c6144] : memref<8x10240xf32, #tpu.memory_space<vmem>>, vector<8x128xf32>
    %c0_145 = arith.constant 0 : index
    %c6144_146 = arith.constant 6144 : index
    %240 = vector.load %arg2[%c0_145, %c6144_146] : memref<1x10240xf32, #tpu.memory_space<vmem>>, vector<1x128xf32>
    %241 = vector.broadcast %240 : vector<1x128xf32> to vector<8x128xf32>
    %242 = arith.mulf %239, %241 : vector<8x128xf32>
    %243 = arith.addf %238, %242 : vector<8x128xf32>
    %c0_147 = arith.constant 0 : index
    %c6272 = arith.constant 6272 : index
    %244 = vector.load %arg1[%c0_147, %c6272] : memref<8x10240xf32, #tpu.memory_space<vmem>>, vector<8x128xf32>
    %c0_148 = arith.constant 0 : index
    %c6272_149 = arith.constant 6272 : index
    %245 = vector.load %arg2[%c0_148, %c6272_149] : memref<1x10240xf32, #tpu.memory_space<vmem>>, vector<1x128xf32>
    %246 = vector.broadcast %245 : vector<1x128xf32> to vector<8x128xf32>
    %247 = arith.mulf %244, %246 : vector<8x128xf32>
    %248 = arith.addf %243, %247 : vector<8x128xf32>
    %c0_150 = arith.constant 0 : index
    %c6400 = arith.constant 6400 : index
    %249 = vector.load %arg1[%c0_150, %c6400] : memref<8x10240xf32, #tpu.memory_space<vmem>>, vector<8x128xf32>
    %c0_151 = arith.constant 0 : index
    %c6400_152 = arith.constant 6400 : index
    %250 = vector.load %arg2[%c0_151, %c6400_152] : memref<1x10240xf32, #tpu.memory_space<vmem>>, vector<1x128xf32>
    %251 = vector.broadcast %250 : vector<1x128xf32> to vector<8x128xf32>
    %252 = arith.mulf %249, %251 : vector<8x128xf32>
    %253 = arith.addf %248, %252 : vector<8x128xf32>
    %c0_153 = arith.constant 0 : index
    %c6528 = arith.constant 6528 : index
    %254 = vector.load %arg1[%c0_153, %c6528] : memref<8x10240xf32, #tpu.memory_space<vmem>>, vector<8x128xf32>
    %c0_154 = arith.constant 0 : index
    %c6528_155 = arith.constant 6528 : index
    %255 = vector.load %arg2[%c0_154, %c6528_155] : memref<1x10240xf32, #tpu.memory_space<vmem>>, vector<1x128xf32>
    %256 = vector.broadcast %255 : vector<1x128xf32> to vector<8x128xf32>
    %257 = arith.mulf %254, %256 : vector<8x128xf32>
    %258 = arith.addf %253, %257 : vector<8x128xf32>
    %c0_156 = arith.constant 0 : index
    %c6656 = arith.constant 6656 : index
    %259 = vector.load %arg1[%c0_156, %c6656] : memref<8x10240xf32, #tpu.memory_space<vmem>>, vector<8x128xf32>
    %c0_157 = arith.constant 0 : index
    %c6656_158 = arith.constant 6656 : index
    %260 = vector.load %arg2[%c0_157, %c6656_158] : memref<1x10240xf32, #tpu.memory_space<vmem>>, vector<1x128xf32>
    %261 = vector.broadcast %260 : vector<1x128xf32> to vector<8x128xf32>
    %262 = arith.mulf %259, %261 : vector<8x128xf32>
    %263 = arith.addf %258, %262 : vector<8x128xf32>
    %c0_159 = arith.constant 0 : index
    %c6784 = arith.constant 6784 : index
    %264 = vector.load %arg1[%c0_159, %c6784] : memref<8x10240xf32, #tpu.memory_space<vmem>>, vector<8x128xf32>
    %c0_160 = arith.constant 0 : index
    %c6784_161 = arith.constant 6784 : index
    %265 = vector.load %arg2[%c0_160, %c6784_161] : memref<1x10240xf32, #tpu.memory_space<vmem>>, vector<1x128xf32>
    %266 = vector.broadcast %265 : vector<1x128xf32> to vector<8x128xf32>
    %267 = arith.mulf %264, %266 : vector<8x128xf32>
    %268 = arith.addf %263, %267 : vector<8x128xf32>
    %c0_162 = arith.constant 0 : index
    %c6912 = arith.constant 6912 : index
    %269 = vector.load %arg1[%c0_162, %c6912] : memref<8x10240xf32, #tpu.memory_space<vmem>>, vector<8x128xf32>
    %c0_163 = arith.constant 0 : index
    %c6912_164 = arith.constant 6912 : index
    %270 = vector.load %arg2[%c0_163, %c6912_164] : memref<1x10240xf32, #tpu.memory_space<vmem>>, vector<1x128xf32>
    %271 = vector.broadcast %270 : vector<1x128xf32> to vector<8x128xf32>
    %272 = arith.mulf %269, %271 : vector<8x128xf32>
    %273 = arith.addf %268, %272 : vector<8x128xf32>
    %c0_165 = arith.constant 0 : index
    %c7040 = arith.constant 7040 : index
    %274 = vector.load %arg1[%c0_165, %c7040] : memref<8x10240xf32, #tpu.memory_space<vmem>>, vector<8x128xf32>
    %c0_166 = arith.constant 0 : index
    %c7040_167 = arith.constant 7040 : index
    %275 = vector.load %arg2[%c0_166, %c7040_167] : memref<1x10240xf32, #tpu.memory_space<vmem>>, vector<1x128xf32>
    %276 = vector.broadcast %275 : vector<1x128xf32> to vector<8x128xf32>
    %277 = arith.mulf %274, %276 : vector<8x128xf32>
    %278 = arith.addf %273, %277 : vector<8x128xf32>
    %c0_168 = arith.constant 0 : index
    %c7168 = arith.constant 7168 : index
    %279 = vector.load %arg1[%c0_168, %c7168] : memref<8x10240xf32, #tpu.memory_space<vmem>>, vector<8x128xf32>
    %c0_169 = arith.constant 0 : index
    %c7168_170 = arith.constant 7168 : index
    %280 = vector.load %arg2[%c0_169, %c7168_170] : memref<1x10240xf32, #tpu.memory_space<vmem>>, vector<1x128xf32>
    %281 = vector.broadcast %280 : vector<1x128xf32> to vector<8x128xf32>
    %282 = arith.mulf %279, %281 : vector<8x128xf32>
    %283 = arith.addf %278, %282 : vector<8x128xf32>
    %c0_171 = arith.constant 0 : index
    %c7296 = arith.constant 7296 : index
    %284 = vector.load %arg1[%c0_171, %c7296] : memref<8x10240xf32, #tpu.memory_space<vmem>>, vector<8x128xf32>
    %c0_172 = arith.constant 0 : index
    %c7296_173 = arith.constant 7296 : index
    %285 = vector.load %arg2[%c0_172, %c7296_173] : memref<1x10240xf32, #tpu.memory_space<vmem>>, vector<1x128xf32>
    %286 = vector.broadcast %285 : vector<1x128xf32> to vector<8x128xf32>
    %287 = arith.mulf %284, %286 : vector<8x128xf32>
    %288 = arith.addf %283, %287 : vector<8x128xf32>
    %c0_174 = arith.constant 0 : index
    %c7424 = arith.constant 7424 : index
    %289 = vector.load %arg1[%c0_174, %c7424] : memref<8x10240xf32, #tpu.memory_space<vmem>>, vector<8x128xf32>
    %c0_175 = arith.constant 0 : index
    %c7424_176 = arith.constant 7424 : index
    %290 = vector.load %arg2[%c0_175, %c7424_176] : memref<1x10240xf32, #tpu.memory_space<vmem>>, vector<1x128xf32>
    %291 = vector.broadcast %290 : vector<1x128xf32> to vector<8x128xf32>
    %292 = arith.mulf %289, %291 : vector<8x128xf32>
    %293 = arith.addf %288, %292 : vector<8x128xf32>
    %c0_177 = arith.constant 0 : index
    %c7552 = arith.constant 7552 : index
    %294 = vector.load %arg1[%c0_177, %c7552] : memref<8x10240xf32, #tpu.memory_space<vmem>>, vector<8x128xf32>
    %c0_178 = arith.constant 0 : index
    %c7552_179 = arith.constant 7552 : index
    %295 = vector.load %arg2[%c0_178, %c7552_179] : memref<1x10240xf32, #tpu.memory_space<vmem>>, vector<1x128xf32>
    %296 = vector.broadcast %295 : vector<1x128xf32> to vector<8x128xf32>
    %297 = arith.mulf %294, %296 : vector<8x128xf32>
    %298 = arith.addf %293, %297 : vector<8x128xf32>
    %c0_180 = arith.constant 0 : index
    %c7680 = arith.constant 7680 : index
    %299 = vector.load %arg1[%c0_180, %c7680] : memref<8x10240xf32, #tpu.memory_space<vmem>>, vector<8x128xf32>
    %c0_181 = arith.constant 0 : index
    %c7680_182 = arith.constant 7680 : index
    %300 = vector.load %arg2[%c0_181, %c7680_182] : memref<1x10240xf32, #tpu.memory_space<vmem>>, vector<1x128xf32>
    %301 = vector.broadcast %300 : vector<1x128xf32> to vector<8x128xf32>
    %302 = arith.mulf %299, %301 : vector<8x128xf32>
    %303 = arith.addf %298, %302 : vector<8x128xf32>
    %c0_183 = arith.constant 0 : index
    %c7808 = arith.constant 7808 : index
    %304 = vector.load %arg1[%c0_183, %c7808] : memref<8x10240xf32, #tpu.memory_space<vmem>>, vector<8x128xf32>
    %c0_184 = arith.constant 0 : index
    %c7808_185 = arith.constant 7808 : index
    %305 = vector.load %arg2[%c0_184, %c7808_185] : memref<1x10240xf32, #tpu.memory_space<vmem>>, vector<1x128xf32>
    %306 = vector.broadcast %305 : vector<1x128xf32> to vector<8x128xf32>
    %307 = arith.mulf %304, %306 : vector<8x128xf32>
    %308 = arith.addf %303, %307 : vector<8x128xf32>
    %c0_186 = arith.constant 0 : index
    %c7936 = arith.constant 7936 : index
    %309 = vector.load %arg1[%c0_186, %c7936] : memref<8x10240xf32, #tpu.memory_space<vmem>>, vector<8x128xf32>
    %c0_187 = arith.constant 0 : index
    %c7936_188 = arith.constant 7936 : index
    %310 = vector.load %arg2[%c0_187, %c7936_188] : memref<1x10240xf32, #tpu.memory_space<vmem>>, vector<1x128xf32>
    %311 = vector.broadcast %310 : vector<1x128xf32> to vector<8x128xf32>
    %312 = arith.mulf %309, %311 : vector<8x128xf32>
    %313 = arith.addf %308, %312 : vector<8x128xf32>
    %c0_189 = arith.constant 0 : index
    %c8064 = arith.constant 8064 : index
    %314 = vector.load %arg1[%c0_189, %c8064] : memref<8x10240xf32, #tpu.memory_space<vmem>>, vector<8x128xf32>
    %c0_190 = arith.constant 0 : index
    %c8064_191 = arith.constant 8064 : index
    %315 = vector.load %arg2[%c0_190, %c8064_191] : memref<1x10240xf32, #tpu.memory_space<vmem>>, vector<1x128xf32>
    %316 = vector.broadcast %315 : vector<1x128xf32> to vector<8x128xf32>
    %317 = arith.mulf %314, %316 : vector<8x128xf32>
    %318 = arith.addf %313, %317 : vector<8x128xf32>
    %c0_192 = arith.constant 0 : index
    %c8192 = arith.constant 8192 : index
    %319 = vector.load %arg1[%c0_192, %c8192] : memref<8x10240xf32, #tpu.memory_space<vmem>>, vector<8x128xf32>
    %c0_193 = arith.constant 0 : index
    %c8192_194 = arith.constant 8192 : index
    %320 = vector.load %arg2[%c0_193, %c8192_194] : memref<1x10240xf32, #tpu.memory_space<vmem>>, vector<1x128xf32>
    %321 = vector.broadcast %320 : vector<1x128xf32> to vector<8x128xf32>
    %322 = arith.mulf %319, %321 : vector<8x128xf32>
    %323 = arith.addf %318, %322 : vector<8x128xf32>
    %c0_195 = arith.constant 0 : index
    %c8320 = arith.constant 8320 : index
    %324 = vector.load %arg1[%c0_195, %c8320] : memref<8x10240xf32, #tpu.memory_space<vmem>>, vector<8x128xf32>
    %c0_196 = arith.constant 0 : index
    %c8320_197 = arith.constant 8320 : index
    %325 = vector.load %arg2[%c0_196, %c8320_197] : memref<1x10240xf32, #tpu.memory_space<vmem>>, vector<1x128xf32>
    %326 = vector.broadcast %325 : vector<1x128xf32> to vector<8x128xf32>
    %327 = arith.mulf %324, %326 : vector<8x128xf32>
    %328 = arith.addf %323, %327 : vector<8x128xf32>
    %c0_198 = arith.constant 0 : index
    %c8448 = arith.constant 8448 : index
    %329 = vector.load %arg1[%c0_198, %c8448] : memref<8x10240xf32, #tpu.memory_space<vmem>>, vector<8x128xf32>
    %c0_199 = arith.constant 0 : index
    %c8448_200 = arith.constant 8448 : index
    %330 = vector.load %arg2[%c0_199, %c8448_200] : memref<1x10240xf32, #tpu.memory_space<vmem>>, vector<1x128xf32>
    %331 = vector.broadcast %330 : vector<1x128xf32> to vector<8x128xf32>
    %332 = arith.mulf %329, %331 : vector<8x128xf32>
    %333 = arith.addf %328, %332 : vector<8x128xf32>
    %c0_201 = arith.constant 0 : index
    %c8576 = arith.constant 8576 : index
    %334 = vector.load %arg1[%c0_201, %c8576] : memref<8x10240xf32, #tpu.memory_space<vmem>>, vector<8x128xf32>
    %c0_202 = arith.constant 0 : index
    %c8576_203 = arith.constant 8576 : index
    %335 = vector.load %arg2[%c0_202, %c8576_203] : memref<1x10240xf32, #tpu.memory_space<vmem>>, vector<1x128xf32>
    %336 = vector.broadcast %335 : vector<1x128xf32> to vector<8x128xf32>
    %337 = arith.mulf %334, %336 : vector<8x128xf32>
    %338 = arith.addf %333, %337 : vector<8x128xf32>
    %c0_204 = arith.constant 0 : index
    %c8704 = arith.constant 8704 : index
    %339 = vector.load %arg1[%c0_204, %c8704] : memref<8x10240xf32, #tpu.memory_space<vmem>>, vector<8x128xf32>
    %c0_205 = arith.constant 0 : index
    %c8704_206 = arith.constant 8704 : index
    %340 = vector.load %arg2[%c0_205, %c8704_206] : memref<1x10240xf32, #tpu.memory_space<vmem>>, vector<1x128xf32>
    %341 = vector.broadcast %340 : vector<1x128xf32> to vector<8x128xf32>
    %342 = arith.mulf %339, %341 : vector<8x128xf32>
    %343 = arith.addf %338, %342 : vector<8x128xf32>
    %c0_207 = arith.constant 0 : index
    %c8832 = arith.constant 8832 : index
    %344 = vector.load %arg1[%c0_207, %c8832] : memref<8x10240xf32, #tpu.memory_space<vmem>>, vector<8x128xf32>
    %c0_208 = arith.constant 0 : index
    %c8832_209 = arith.constant 8832 : index
    %345 = vector.load %arg2[%c0_208, %c8832_209] : memref<1x10240xf32, #tpu.memory_space<vmem>>, vector<1x128xf32>
    %346 = vector.broadcast %345 : vector<1x128xf32> to vector<8x128xf32>
    %347 = arith.mulf %344, %346 : vector<8x128xf32>
    %348 = arith.addf %343, %347 : vector<8x128xf32>
    %c0_210 = arith.constant 0 : index
    %c8960 = arith.constant 8960 : index
    %349 = vector.load %arg1[%c0_210, %c8960] : memref<8x10240xf32, #tpu.memory_space<vmem>>, vector<8x128xf32>
    %c0_211 = arith.constant 0 : index
    %c8960_212 = arith.constant 8960 : index
    %350 = vector.load %arg2[%c0_211, %c8960_212] : memref<1x10240xf32, #tpu.memory_space<vmem>>, vector<1x128xf32>
    %351 = vector.broadcast %350 : vector<1x128xf32> to vector<8x128xf32>
    %352 = arith.mulf %349, %351 : vector<8x128xf32>
    %353 = arith.addf %348, %352 : vector<8x128xf32>
    %c0_213 = arith.constant 0 : index
    %c9088 = arith.constant 9088 : index
    %354 = vector.load %arg1[%c0_213, %c9088] : memref<8x10240xf32, #tpu.memory_space<vmem>>, vector<8x128xf32>
    %c0_214 = arith.constant 0 : index
    %c9088_215 = arith.constant 9088 : index
    %355 = vector.load %arg2[%c0_214, %c9088_215] : memref<1x10240xf32, #tpu.memory_space<vmem>>, vector<1x128xf32>
    %356 = vector.broadcast %355 : vector<1x128xf32> to vector<8x128xf32>
    %357 = arith.mulf %354, %356 : vector<8x128xf32>
    %358 = arith.addf %353, %357 : vector<8x128xf32>
    %c0_216 = arith.constant 0 : index
    %c9216 = arith.constant 9216 : index
    %359 = vector.load %arg1[%c0_216, %c9216] : memref<8x10240xf32, #tpu.memory_space<vmem>>, vector<8x128xf32>
    %c0_217 = arith.constant 0 : index
    %c9216_218 = arith.constant 9216 : index
    %360 = vector.load %arg2[%c0_217, %c9216_218] : memref<1x10240xf32, #tpu.memory_space<vmem>>, vector<1x128xf32>
    %361 = vector.broadcast %360 : vector<1x128xf32> to vector<8x128xf32>
    %362 = arith.mulf %359, %361 : vector<8x128xf32>
    %363 = arith.addf %358, %362 : vector<8x128xf32>
    %c0_219 = arith.constant 0 : index
    %c9344 = arith.constant 9344 : index
    %364 = vector.load %arg1[%c0_219, %c9344] : memref<8x10240xf32, #tpu.memory_space<vmem>>, vector<8x128xf32>
    %c0_220 = arith.constant 0 : index
    %c9344_221 = arith.constant 9344 : index
    %365 = vector.load %arg2[%c0_220, %c9344_221] : memref<1x10240xf32, #tpu.memory_space<vmem>>, vector<1x128xf32>
    %366 = vector.broadcast %365 : vector<1x128xf32> to vector<8x128xf32>
    %367 = arith.mulf %364, %366 : vector<8x128xf32>
    %368 = arith.addf %363, %367 : vector<8x128xf32>
    %c0_222 = arith.constant 0 : index
    %c9472 = arith.constant 9472 : index
    %369 = vector.load %arg1[%c0_222, %c9472] : memref<8x10240xf32, #tpu.memory_space<vmem>>, vector<8x128xf32>
    %c0_223 = arith.constant 0 : index
    %c9472_224 = arith.constant 9472 : index
    %370 = vector.load %arg2[%c0_223, %c9472_224] : memref<1x10240xf32, #tpu.memory_space<vmem>>, vector<1x128xf32>
    %371 = vector.broadcast %370 : vector<1x128xf32> to vector<8x128xf32>
    %372 = arith.mulf %369, %371 : vector<8x128xf32>
    %373 = arith.addf %368, %372 : vector<8x128xf32>
    %c0_225 = arith.constant 0 : index
    %c9600 = arith.constant 9600 : index
    %374 = vector.load %arg1[%c0_225, %c9600] : memref<8x10240xf32, #tpu.memory_space<vmem>>, vector<8x128xf32>
    %c0_226 = arith.constant 0 : index
    %c9600_227 = arith.constant 9600 : index
    %375 = vector.load %arg2[%c0_226, %c9600_227] : memref<1x10240xf32, #tpu.memory_space<vmem>>, vector<1x128xf32>
    %376 = vector.broadcast %375 : vector<1x128xf32> to vector<8x128xf32>
    %377 = arith.mulf %374, %376 : vector<8x128xf32>
    %378 = arith.addf %373, %377 : vector<8x128xf32>
    %c0_228 = arith.constant 0 : index
    %c9728 = arith.constant 9728 : index
    %379 = vector.load %arg1[%c0_228, %c9728] : memref<8x10240xf32, #tpu.memory_space<vmem>>, vector<8x128xf32>
    %c0_229 = arith.constant 0 : index
    %c9728_230 = arith.constant 9728 : index
    %380 = vector.load %arg2[%c0_229, %c9728_230] : memref<1x10240xf32, #tpu.memory_space<vmem>>, vector<1x128xf32>
    %381 = vector.broadcast %380 : vector<1x128xf32> to vector<8x128xf32>
    %382 = arith.mulf %379, %381 : vector<8x128xf32>
    %383 = arith.addf %378, %382 : vector<8x128xf32>
    %c0_231 = arith.constant 0 : index
    %c9856 = arith.constant 9856 : index
    %384 = vector.load %arg1[%c0_231, %c9856] : memref<8x10240xf32, #tpu.memory_space<vmem>>, vector<8x128xf32>
    %c0_232 = arith.constant 0 : index
    %c9856_233 = arith.constant 9856 : index
    %385 = vector.load %arg2[%c0_232, %c9856_233] : memref<1x10240xf32, #tpu.memory_space<vmem>>, vector<1x128xf32>
    %386 = vector.broadcast %385 : vector<1x128xf32> to vector<8x128xf32>
    %387 = arith.mulf %384, %386 : vector<8x128xf32>
    %388 = arith.addf %383, %387 : vector<8x128xf32>
    %c0_234 = arith.constant 0 : index
    %c9984 = arith.constant 9984 : index
    %389 = vector.load %arg1[%c0_234, %c9984] : memref<8x10240xf32, #tpu.memory_space<vmem>>, vector<8x128xf32>
    %c0_235 = arith.constant 0 : index
    %c9984_236 = arith.constant 9984 : index
    %390 = vector.load %arg2[%c0_235, %c9984_236] : memref<1x10240xf32, #tpu.memory_space<vmem>>, vector<1x128xf32>
    %391 = vector.broadcast %390 : vector<1x128xf32> to vector<8x128xf32>
    %392 = arith.mulf %389, %391 : vector<8x128xf32>
    %393 = arith.addf %388, %392 : vector<8x128xf32>
    %c0_237 = arith.constant 0 : index
    %c10112 = arith.constant 10112 : index
    %394 = vector.load %arg1[%c0_237, %c10112] : memref<8x10240xf32, #tpu.memory_space<vmem>>, vector<8x128xf32>
    %c0_238 = arith.constant 0 : index
    %c10112_239 = arith.constant 10112 : index
    %395 = vector.load %arg2[%c0_238, %c10112_239] : memref<1x10240xf32, #tpu.memory_space<vmem>>, vector<1x128xf32>
    %396 = vector.broadcast %395 : vector<1x128xf32> to vector<8x128xf32>
    %397 = arith.mulf %394, %396 : vector<8x128xf32>
    %398 = arith.addf %393, %397 : vector<8x128xf32>
    %cst = arith.constant dense<0.000000e+00> : vector<8xf32>
    %399 = vector.multi_reduction <add>, %398, %cst [1] : vector<8x128xf32> to vector<8xf32>
    %400 = vector.shape_cast %399 : vector<8xf32> to vector<8x1xf32>
    %c0_240 = arith.constant 0 : index
    %c0_241 = arith.constant 0 : index
    %401 = vector.load %arg3[%c0_240, %c0_241] : memref<1x1xf32, #tpu.memory_space<vmem>>, vector<1x1xf32>
    %402 = vector.broadcast %401 : vector<1x1xf32> to vector<8x1xf32>
    %403 = arith.addf %400, %402 : vector<8x1xf32>
    %404 = arith.negf %403 : vector<8x1xf32>
    %405 = math.exp %404 : vector<8x1xf32>
    %cst_242 = arith.constant 1.000000e+00 : f32
    %406 = vector.broadcast %cst_242 : f32 to vector<8x1xf32>
    %407 = arith.addf %406, %405 : vector<8x1xf32>
    %408 = arith.divf %406, %407 : vector<8x1xf32>
    %c0_243 = arith.constant 0 : index
    %c0_244 = arith.constant 0 : index
    %409 = vector.load %arg4[%c0_243, %c0_244] : memref<8x1xf32, #tpu.memory_space<vmem>>, vector<8x1xf32>
    tpu.vector_store %arg4[%c0_243, %c0_244], %408 {strides = array<i32>} : memref<8x1xf32, #tpu.memory_space<vmem>>, vector<8x1xf32>,
    return
  }
  func.func @transform_0(%arg0: i32) -> (i32, i32) {
    %c0_i32 = arith.constant 0 : i32
    %c0_i32_0 = arith.constant 0 : i32
    return %arg0, %c0_i32 : i32, i32
  }
  func.func @transform_1(%arg0: i32) -> (i32, i32) {
    %c0_i32 = arith.constant 0 : i32
    %c0_i32_0 = arith.constant 0 : i32
    %c0_i32_1 = arith.constant 0 : i32
    return %c0_i32, %c0_i32_0 : i32, i32
  }
  func.func @transform_2(%arg0: i32) -> (i32, i32) {
    %c0_i32 = arith.constant 0 : i32
    %c0_i32_0 = arith.constant 0 : i32
    %c0_i32_1 = arith.constant 0 : i32
    return %c0_i32, %c0_i32_0 : i32, i32
  }
  func.func @transform_3(%arg0: i32) -> (i32, i32) {
    %c0_i32 = arith.constant 0 : i32
    %c0_i32_0 = arith.constant 0 : i32
    return %arg0, %c0_i32 : i32, i32
  }
}

</mosaic_0001>

<bundles_post_ra>
// kernel: tpu_custom_call.1
= control target key start
LH: loop header
LB: loop body
LE: loop exit
PB: predicated region body
PF: predicated region fallthrough
CT: control target
= control target key end

     0   :  { %s1051_s0 = inlined_call_operand.hbm [shape: f32[8,10240], index: 0, kind: input, shape index: {}]   ;;  %s1052_s1 = inlined_call_operand.hbm [shape: f32[1,10240], index: 1, kind: input, shape index: {}]   ;;  %s1053_s2 = inlined_call_operand.<no memory space> [shape: f32[1,1], index: 2, kind: input, shape index: {}]   ;;  %s1054_s3 = inlined_call_operand.vmem [shape: f32[8,1], index: 3, kind: output, shape index: {}]  }
   0x1   :  { %v8_v0 = vstv %s1053_s2 }
   0x2   :  { %9 = vst [vmem:[#allocation2] sm:$0x1] %v8_v0 }
   0x3   :  { %10 = vsyncpa [#allocation4], 0 }
   0x4   :  { %11 = vsyncpa [#allocation6], 0  ;;  %s999_s14 = smov [#allocation3]   ;;  %s1000_s16 = smov [#allocation5]  }
   0x5   :  { %s18_s15 = sshll.u32 %s999_s14, 4  ;;  %s28_s17 = sshll.u32 %s1000_s16, 4  ;;  %s19_s15 = int_to_ptr.vmem [resolvable:$true] %s18_s15  ;;  %s29_s17 = int_to_ptr.vmem [resolvable:$true] %s28_s17 }
   0x6   :  { %s951_s20 = scalar_lea.hbm %s1051_s0, 10240 }
   0x7   :  { %p952_p0 = scmp.ne.s32.totalorder %s1051_s0, %s951_s20  ;;  %p955_p1 = scmp.lt.u32.totalorder %s951_s20, %s1051_s0 }
   0x9   :  { %p957_p2 = pnand %p955_p1, %p952_p0 }
   0xb   :  { %960 = shalt.err (!%p957_p2)
}
   0xc   :  { %s961_s2 = scalar_lea.vmem %s19_s15, 10240  ;;  %p966_p4 = scmp.lt.s32.totalorder %s19_s15, %s19_s15 }
   0xd   :  { %p962_p3 = scmp.ne.s32.totalorder %s19_s15, %s961_s2  ;;  %p967_p5 = scmp.lt.s32.totalorder %s961_s2, %s961_s2 }
   0xf   :  { %p968_p6 = por %p967_p5, %p966_p4 }
  0x11   :  { %p969_p7 = pnand %p968_p6, %p962_p3 }
  0x13   :  { %972 = shalt.err (!%p969_p7)
}
  0x14   :  { %21 = dma.hbm_to_vmem [thread:$0]  %s1051_s0, 10240, %s19_s15, [#allocation4]  }
  0x15   :  { %s973_s29 = scalar_lea.hbm %s1052_s1, 1280 }
  0x16   :  { %p974_p8 = scmp.ne.s32.totalorder %s1052_s1, %s973_s29  ;;  %p977_p9 = scmp.lt.u32.totalorder %s973_s29, %s1052_s1 }
  0x18   :  { %p979_p10 = pnand %p977_p9, %p974_p8 }
  0x1a   :  { %982 = shalt.err (!%p979_p10)
}
  0x1b   :  { %s983_s7 = scalar_lea.vmem %s29_s17, 1280  ;;  %p988_p12 = scmp.lt.s32.totalorder %s29_s17, %s29_s17 }
  0x1c   :  { %p984_p11 = scmp.ne.s32.totalorder %s29_s17, %s983_s7  ;;  %p989_p13 = scmp.lt.s32.totalorder %s983_s7, %s983_s7 }
  0x1e   :  { %p990_p0 = por %p989_p13, %p988_p12 }
  0x20   :  { %p991_p1 = pnand %p990_p0, %p984_p11 }
  0x22   :  { %994 = shalt.err (!%p991_p1)
}
  0x23   :  { %31 = dma.hbm_to_vmem [thread:$0]  %s1052_s1, 1280, %s29_s17, [#allocation6]  }
  0x24   :  { %995 = dma.done.wait [#allocation4], 10240  }
  0x25   :  { %996 = vsyncadd [#allocation4], 4294957056 }
  0x26   :  { %997 = dma.done.wait [#allocation6], 1280  }
  0x27   :  { %998 = vsyncadd [#allocation6], 4294966016  ;;  %v40_v1 = vld [vmem:[#allocation3] sm:$0xff]  ;;  %v49_v3 = vld [vmem:[#allocation3 + $0x8] sm:$0xff]  ;;  %vm855_vm0 = vcmask 7168  }
  0x28   :  { %v863_v2 = vld [vmem:[#allocation5] ss:$0 sm:$0xff]  ;;  %v864_v5 = vld [vmem:[#allocation5 + $0x1] ss:$0 sm:$0xff]  ;;  %v59_v6 = vld [vmem:[#allocation3 + $0x10] sm:$0xff] }
  0x29   :  { %v48_v4 = vmul.f32 %v863_v2, %v40_v1  ;;  %v865_v7 = vld [vmem:[#allocation5 + $0x2] ss:$0 sm:$0xff]  ;;  %v57_v8 = vmul.f32 %v864_v5, %v49_v3  ;;  %v69_v10 = vld [vmem:[#allocation3 + $0x18] sm:$0xff]  ;;  %v866_v11 = vld [vmem:[#allocation5 + $0x3] ss:$0 sm:$0xff] }
  0x2a   :  { %v67_v9 = vmul.f32 %v865_v7, %v59_v6  ;;  %v79_v12 = vld [vmem:[#allocation3 + $0x20] sm:$0xff]  ;;  %v77_v15 = vmul.f32 %v866_v11, %v69_v10  ;;  %v89_v16 = vld [vmem:[#allocation3 + $0x28] sm:$0xff]  ;;  %v99_v20 = vld [vmem:[#allocation3 + $0x30] sm:$0xff] }
  0x2b   :  { %v867_v13 = vld [vmem:[#allocation5 + $0x4] ss:$0 sm:$0xff]  ;;  %v58_v14 = vadd.f32 %v57_v8, %v48_v4  ;;  %v868_v17 = vld [vmem:[#allocation5 + $0x5] ss:$0 sm:$0xff]  ;;  %v869_v21 = vld [vmem:[#allocation5 + $0x6] ss:$0 sm:$0xff] }
  0x2c   :  { %v87_v19 = vmul.f32 %v867_v13, %v79_v12  ;;  %v97_v23 = vmul.f32 %v868_v17, %v89_v16  ;;  %v109_v24 = vld [vmem:[#allocation3 + $0x38] sm:$0xff]  ;;  %v870_v25 = vld [vmem:[#allocation5 + $0x7] ss:$0 sm:$0xff]  ;;  %v107_v27 = vmul.f32 %v869_v21, %v99_v20  ;;  %v871_v29 = vld [vmem:[#allocation5 + $0x8] ss:$0 sm:$0xff] }
  0x2d   :  { %v68_v18 = vadd.f32 %v67_v9, %v58_v14  ;;  %v119_v28 = vld [vmem:[#allocation3 + $0x40] sm:$0xff]  ;;  %v117_v31 = vmul.f32 %v870_v25, %v109_v24  ;;  %v129_v32 = vld [vmem:[#allocation3 + $0x48] sm:$0xff]  ;;  %v139_v36 = vld [vmem:[#allocation3 + $0x50] sm:$0xff] }
  0x2e   :  { %v872_v33 = vld [vmem:[#allocation5 + $0x9] ss:$0 sm:$0xff]  ;;  %v127_v35 = vmul.f32 %v871_v29, %v119_v28  ;;  %v873_v37 = vld [vmem:[#allocation5 + $0xa] ss:$0 sm:$0xff]  ;;  %v149_v40 = vld [vmem:[#allocation3 + $0x58] sm:$0xff] }
  0x2f   :  { %v78_v22 = vadd.f32 %v77_v15, %v68_v18  ;;  %v137_v39 = vmul.f32 %v872_v33, %v129_v32  ;;  %v874_v41 = vld [vmem:[#allocation5 + $0xb] ss:$0 sm:$0xff]  ;;  %v147_v43 = vmul.f32 %v873_v37, %v139_v36  ;;  %v159_v44 = vld [vmem:[#allocation3 + $0x60] sm:$0xff]  ;;  %v875_v45 = vld [vmem:[#allocation5 + $0xc] ss:$0 sm:$0xff] }
  0x30   :  { %v157_v47 = vmul.f32 %v874_v41, %v149_v40  ;;  %v169_v48 = vld [vmem:[#allocation3 + $0x68] sm:$0xff]  ;;  %v167_v51 = vmul.f32 %v875_v45, %v159_v44  ;;  %v179_v52 = vld [vmem:[#allocation3 + $0x70] sm:$0xff]  ;;  %v189_v56 = vld [vmem:[#allocation3 + $0x78] sm:$0xff] }
  0x31   :  { %v88_v26 = vadd.f32 %v87_v19, %v78_v22  ;;  %v876_v49 = vld [vmem:[#allocation5 + $0xd] ss:$0 sm:$0xff]  ;;  %v877_v53 = vld [vmem:[#allocation5 + $0xe] ss:$0 sm:$0xff]  ;;  %v878_v57 = vld [vmem:[#allocation5 + $0xf] ss:$0 sm:$0xff] }
  0x32   :  { %v177_v55 = vmul.f32 %v876_v49, %v169_v48  ;;  %v187_v59 = vmul.f32 %v877_v53, %v179_v52  ;;  %v199_v60 = vld [vmem:[#allocation3 + $0x80] sm:$0xff]  ;;  %v879_v61 = vld [vmem:[#allocation5 + $0x10] ss:$0 sm:$0xff]  ;;  %v197_v63 = vmul.f32 %v878_v57, %v189_v56  ;;  %v209_v0 = vld [vmem:[#allocation3 + $0x88] sm:$0xff] }
  0x33   :  { %v98_v30 = vadd.f32 %v97_v23, %v88_v26  ;;  %v880_v1 = vld [vmem:[#allocation5 + $0x11] ss:$0 sm:$0xff]  ;;  %v207_v3 = vmul.f32 %v879_v61, %v199_v60  ;;  %v881_v5 = vld [vmem:[#allocation5 + $0x12] ss:$0 sm:$0xff]  ;;  %v229_v8 = vld [vmem:[#allocation3 + $0x98] sm:$0xff] }
  0x34   :  { %v219_v4 = vld [vmem:[#allocation3 + $0x90] sm:$0xff]  ;;  %v217_v7 = vmul.f32 %v880_v1, %v209_v0  ;;  %v239_v12 = vld [vmem:[#allocation3 + $0xa0] sm:$0xff]  ;;  %v249_v16 = vld [vmem:[#allocation3 + $0xa8] sm:$0xff] }
  0x35   :  { %v108_v34 = vadd.f32 %v107_v27, %v98_v30  ;;  %v882_v9 = vld [vmem:[#allocation5 + $0x13] ss:$0 sm:$0xff]  ;;  %v227_v11 = vmul.f32 %v881_v5, %v219_v4  ;;  %v883_v13 = vld [vmem:[#allocation5 + $0x14] ss:$0 sm:$0xff]  ;;  %v884_v17 = vld [vmem:[#allocation5 + $0x15] ss:$0 sm:$0xff] }
  0x36   :  { %v237_v15 = vmul.f32 %v882_v9, %v229_v8  ;;  %v247_v19 = vmul.f32 %v883_v13, %v239_v12  ;;  %v259_v20 = vld [vmem:[#allocation3 + $0xb0] sm:$0xff]  ;;  %v257_v23 = vmul.f32 %v884_v17, %v249_v16  ;;  %v269_v24 = vld [vmem:[#allocation3 + $0xb8] sm:$0xff]  ;;  %v279_v28 = vld [vmem:[#allocation3 + $0xc0] sm:$0xff] }
  0x37   :  { %v118_v38 = vadd.f32 %v117_v31, %v108_v34  ;;  %v885_v21 = vld [vmem:[#allocation5 + $0x16] ss:$0 sm:$0xff]  ;;  %v886_v25 = vld [vmem:[#allocation5 + $0x17] ss:$0 sm:$0xff]  ;;  %v887_v29 = vld [vmem:[#allocation5 + $0x18] ss:$0 sm:$0xff] }
  0x38   :  { %v267_v27 = vmul.f32 %v885_v21, %v259_v20  ;;  %v277_v31 = vmul.f32 %v886_v25, %v269_v24  ;;  %v289_v32 = vld [vmem:[#allocation3 + $0xc8] sm:$0xff]  ;;  %v888_v33 = vld [vmem:[#allocation5 + $0x19] ss:$0 sm:$0xff]  ;;  %v299_v36 = vld [vmem:[#allocation3 + $0xd0] sm:$0xff] }
  0x39   :  { %v128_v42 = vadd.f32 %v127_v35, %v118_v38  ;;  %v287_v35 = vmul.f32 %v887_v29, %v279_v28  ;;  %v889_v37 = vld [vmem:[#allocation5 + $0x1a] ss:$0 sm:$0xff]  ;;  %v890_v41 = vld [vmem:[#allocation5 + $0x1b] ss:$0 sm:$0xff]  ;;  %v319_v44 = vld [vmem:[#allocation3 + $0xe0] sm:$0xff] }
  0x3a   :  { %v309_v40 = vld [vmem:[#allocation3 + $0xd8] sm:$0xff]  ;;  %v329_v48 = vld [vmem:[#allocation3 + $0xe8] sm:$0xff]  ;;  %v339_v52 = vld [vmem:[#allocation3 + $0xf0] sm:$0xff] }
  0x3b   :  { %v138_v46 = vadd.f32 %v137_v39, %v128_v42  ;;  %v297_v39 = vmul.f32 %v888_v33, %v289_v32  ;;  %v891_v45 = vld [vmem:[#allocation5 + $0x1c] ss:$0 sm:$0xff]  ;;  %v892_v49 = vld [vmem:[#allocation5 + $0x1d] ss:$0 sm:$0xff]  ;;  %v893_v53 = vld [vmem:[#allocation5 + $0x1e] ss:$0 sm:$0xff] }
  0x3c   :  { %v349_v56 = vld [vmem:[#allocation3 + $0xf8] sm:$0xff]  ;;  %v359_v60 = vld [vmem:[#allocation3 + $0x100] sm:$0xff]  ;;  %v369_v0 = vld [vmem:[#allocation3 + $0x108] sm:$0xff] }
  0x3d   :  { %v148_v50 = vadd.f32 %v147_v43, %v138_v46  ;;  %v307_v43 = vmul.f32 %v889_v37, %v299_v36  ;;  %v894_v57 = vld [vmem:[#allocation5 + $0x1f] ss:$0 sm:$0xff]  ;;  %v895_v61 = vld [vmem:[#allocation5 + $0x20] ss:$0 sm:$0xff]  ;;  %v896_v1 = vld [vmem:[#allocation5 + $0x21] ss:$0 sm:$0xff] }
  0x3e   :  { %v379_v4 = vld [vmem:[#allocation3 + $0x110] sm:$0xff]  ;;  %v897_v5 = vld [vmem:[#allocation5 + $0x22] ss:$0 sm:$0xff]  ;;  %v389_v8 = vld [vmem:[#allocation3 + $0x118] sm:$0xff] }
  0x3f   :  { %v158_v54 = vadd.f32 %v157_v47, %v148_v50  ;;  %v317_v47 = vmul.f32 %v890_v41, %v309_v40  ;;  %v898_v9 = vld [vmem:[#allocation5 + $0x23] ss:$0 sm:$0xff]  ;;  %v899_v13 = vld [vmem:[#allocation5 + $0x24] ss:$0 sm:$0xff]  ;;  %v409_v16 = vld [vmem:[#allocation3 + $0x128] sm:$0xff] }
  0x40   :  { %v399_v12 = vld [vmem:[#allocation3 + $0x120] sm:$0xff]  ;;  %v419_v20 = vld [vmem:[#allocation3 + $0x130] sm:$0xff]  ;;  %v429_v24 = vld [vmem:[#allocation3 + $0x138] sm:$0xff] }
  0x41   :  { %v168_v58 = vadd.f32 %v167_v51, %v158_v54  ;;  %v327_v51 = vmul.f32 %v891_v45, %v319_v44  ;;  %v900_v17 = vld [vmem:[#allocation5 + $0x25] ss:$0 sm:$0xff]  ;;  %v901_v21 = vld [vmem:[#allocation5 + $0x26] ss:$0 sm:$0xff]  ;;  %v902_v25 = vld [vmem:[#allocation5 + $0x27] ss:$0 sm:$0xff] }
  0x42   :  { %v439_v28 = vld [vmem:[#allocation3 + $0x140] sm:$0xff]  ;;  %v903_v29 = vld [vmem:[#allocation5 + $0x28] ss:$0 sm:$0xff]  ;;  %v904_v33 = vld [vmem:[#allocation5 + $0x29] ss:$0 sm:$0xff] }
  0x43   :  { %v178_v62 = vadd.f32 %v177_v55, %v168_v58  ;;  %v337_v55 = vmul.f32 %v892_v49, %v329_v48  ;;  %v449_v32 = vld [vmem:[#allocation3 + $0x148] sm:$0xff]  ;;  %v459_v36 = vld [vmem:[#allocation3 + $0x150] sm:$0xff]  ;;  %v469_v40 = vld [vmem:[#allocation3 + $0x158] sm:$0xff] }
  0x44   :  { %v905_v37 = vld [vmem:[#allocation5 + $0x2a] ss:$0 sm:$0xff]  ;;  %v906_v41 = vld [vmem:[#allocation5 + $0x2b] ss:$0 sm:$0xff]  ;;  %v479_v44 = vld [vmem:[#allocation3 + $0x160] sm:$0xff] }
  0x45   :  { %v188_v2 = vadd.f32 %v187_v59, %v178_v62  ;;  %v347_v59 = vmul.f32 %v893_v53, %v339_v52  ;;  %v907_v45 = vld [vmem:[#allocation5 + $0x2c] ss:$0 sm:$0xff]  ;;  %v908_v49 = vld [vmem:[#allocation5 + $0x2d] ss:$0 sm:$0xff]  ;;  %v499_v52 = vld [vmem:[#allocation3 + $0x170] sm:$0xff] }
  0x46   :  { %v489_v48 = vld [vmem:[#allocation3 + $0x168] sm:$0xff] }
  0x47   :  { %v198_v6 = vadd.f32 %v197_v63, %v188_v2  ;;  %v357_v63 = vmul.f32 %v894_v57, %v349_v56  ;;  %v909_v53 = vld [vmem:[#allocation5 + $0x2e] ss:$0 sm:$0xff]  ;;  %v509_v56 = vld [vmem:[#allocation3 + $0x178] sm:$0xff]  ;;  %v910_v57 = vld [vmem:[#allocation5 + $0x2f] ss:$0 sm:$0xff] }
  0x49   :  { %v208_v10 = vadd.f32 %v207_v3, %v198_v6  ;;  %v367_v3 = vmul.f32 %v895_v61, %v359_v60  ;;  %v519_v60 = vld [vmem:[#allocation3 + $0x180] sm:$0xff]  ;;  %v911_v61 = vld [vmem:[#allocation5 + $0x30] ss:$0 sm:$0xff] }
  0x4b   :  { %v218_v14 = vadd.f32 %v217_v7, %v208_v10  ;;  %v377_v7 = vmul.f32 %v896_v1, %v369_v0  ;;  %v529_v0 = vld [vmem:[#allocation3 + $0x188] sm:$0xff]  ;;  %v912_v1 = vld [vmem:[#allocation5 + $0x31] ss:$0 sm:$0xff] }
  0x4d   :  { %v228_v18 = vadd.f32 %v227_v11, %v218_v14  ;;  %v387_v11 = vmul.f32 %v897_v5, %v379_v4  ;;  %v539_v4 = vld [vmem:[#allocation3 + $0x190] sm:$0xff] }
  0x4e   :  { %v913_v5 = vld [vmem:[#allocation5 + $0x32] ss:$0 sm:$0xff] }
  0x4f   :  { %v238_v22 = vadd.f32 %v237_v15, %v228_v18  ;;  %v397_v15 = vmul.f32 %v898_v9, %v389_v8  ;;  %v549_v8 = vld [vmem:[#allocation3 + $0x198] sm:$0xff]  ;;  %v914_v9 = vld [vmem:[#allocation5 + $0x33] ss:$0 sm:$0xff] }
  0x51   :  { %v248_v26 = vadd.f32 %v247_v19, %v238_v22  ;;  %v407_v19 = vmul.f32 %v899_v13, %v399_v12  ;;  %v559_v12 = vld [vmem:[#allocation3 + $0x1a0] sm:$0xff]  ;;  %v915_v13 = vld [vmem:[#allocation5 + $0x34] ss:$0 sm:$0xff] }
  0x53   :  { %v258_v30 = vadd.f32 %v257_v23, %v248_v26  ;;  %v417_v23 = vmul.f32 %v900_v17, %v409_v16  ;;  %v569_v16 = vld [vmem:[#allocation3 + $0x1a8] sm:$0xff]  ;;  %v916_v17 = vld [vmem:[#allocation5 + $0x35] ss:$0 sm:$0xff] }
  0x55   :  { %v268_v34 = vadd.f32 %v267_v27, %v258_v30  ;;  %v427_v27 = vmul.f32 %v901_v21, %v419_v20  ;;  %v579_v20 = vld [vmem:[#allocation3 + $0x1b0] sm:$0xff] }
  0x56   :  { %v917_v21 = vld [vmem:[#allocation5 + $0x36] ss:$0 sm:$0xff] }
  0x57   :  { %v278_v38 = vadd.f32 %v277_v31, %v268_v34  ;;  %v437_v31 = vmul.f32 %v902_v25, %v429_v24  ;;  %v589_v24 = vld [vmem:[#allocation3 + $0x1b8] sm:$0xff]  ;;  %v918_v25 = vld [vmem:[#allocation5 + $0x37] ss:$0 sm:$0xff] }
  0x59   :  { %v288_v42 = vadd.f32 %v287_v35, %v278_v38  ;;  %v447_v35 = vmul.f32 %v903_v29, %v439_v28  ;;  %v599_v28 = vld [vmem:[#allocation3 + $0x1c0] sm:$0xff]  ;;  %v919_v29 = vld [vmem:[#allocation5 + $0x38] ss:$0 sm:$0xff] }
  0x5b   :  { %v298_v46 = vadd.f32 %v297_v39, %v288_v42  ;;  %v457_v39 = vmul.f32 %v904_v33, %v449_v32  ;;  %v609_v32 = vld [vmem:[#allocation3 + $0x1c8] sm:$0xff]  ;;  %v920_v33 = vld [vmem:[#allocation5 + $0x39] ss:$0 sm:$0xff] }
  0x5d   :  { %v308_v50 = vadd.f32 %v307_v43, %v298_v46  ;;  %v467_v43 = vmul.f32 %v905_v37, %v459_v36  ;;  %v619_v36 = vld [vmem:[#allocation3 + $0x1d0] sm:$0xff]  ;;  %v921_v37 = vld [vmem:[#allocation5 + $0x3a] ss:$0 sm:$0xff] }
  0x5f   :  { %v318_v54 = vadd.f32 %v317_v47, %v308_v50  ;;  %v477_v47 = vmul.f32 %v906_v41, %v469_v40  ;;  %v629_v40 = vld [vmem:[#allocation3 + $0x1d8] sm:$0xff] }
  0x60   :  { %v922_v41 = vld [vmem:[#allocation5 + $0x3b] ss:$0 sm:$0xff] }
  0x61   :  { %v328_v58 = vadd.f32 %v327_v51, %v318_v54  ;;  %v487_v51 = vmul.f32 %v907_v45, %v479_v44  ;;  %v639_v44 = vld [vmem:[#allocation3 + $0x1e0] sm:$0xff]  ;;  %v923_v45 = vld [vmem:[#allocation5 + $0x3c] ss:$0 sm:$0xff] }
  0x63   :  { %v338_v62 = vadd.f32 %v337_v55, %v328_v58  ;;  %v497_v55 = vmul.f32 %v908_v49, %v489_v48  ;;  %v649_v48 = vld [vmem:[#allocation3 + $0x1e8] sm:$0xff]  ;;  %v924_v49 = vld [vmem:[#allocation5 + $0x3d] ss:$0 sm:$0xff] }
  0x65   :  { %v348_v2 = vadd.f32 %v347_v59, %v338_v62  ;;  %v507_v59 = vmul.f32 %v909_v53, %v499_v52  ;;  %v659_v52 = vld [vmem:[#allocation3 + $0x1f0] sm:$0xff]  ;;  %v925_v53 = vld [vmem:[#allocation5 + $0x3e] ss:$0 sm:$0xff] }
  0x67   :  { %v358_v6 = vadd.f32 %v357_v63, %v348_v2  ;;  %v517_v63 = vmul.f32 %v910_v57, %v509_v56  ;;  %v669_v56 = vld [vmem:[#allocation3 + $0x1f8] sm:$0xff] }
  0x68   :  { %v926_v57 = vld [vmem:[#allocation5 + $0x3f] ss:$0 sm:$0xff] }
  0x69   :  { %v368_v10 = vadd.f32 %v367_v3, %v358_v6  ;;  %v527_v3 = vmul.f32 %v911_v61, %v519_v60  ;;  %v679_v60 = vld [vmem:[#allocation3 + $0x200] sm:$0xff] }
  0x6a   :  { %v927_v61 = vld [vmem:[#allocation5 + $0x40] ss:$0 sm:$0xff] }
  0x6b   :  { %v378_v14 = vadd.f32 %v377_v7, %v368_v10  ;;  %v537_v7 = vmul.f32 %v912_v1, %v529_v0  ;;  %v689_v0 = vld [vmem:[#allocation3 + $0x208] sm:$0xff]  ;;  %v928_v1 = vld [vmem:[#allocation5 + $0x41] ss:$0 sm:$0xff] }
  0x6d   :  { %v388_v18 = vadd.f32 %v387_v11, %v378_v14  ;;  %v547_v11 = vmul.f32 %v913_v5, %v539_v4  ;;  %v699_v4 = vld [vmem:[#allocation3 + $0x210] sm:$0xff]  ;;  %v929_v5 = vld [vmem:[#allocation5 + $0x42] ss:$0 sm:$0xff] }
  0x6f   :  { %v398_v22 = vadd.f32 %v397_v15, %v388_v18  ;;  %v557_v15 = vmul.f32 %v914_v9, %v549_v8  ;;  %v709_v8 = vld [vmem:[#allocation3 + $0x218] sm:$0xff]  ;;  %v930_v9 = vld [vmem:[#allocation5 + $0x43] ss:$0 sm:$0xff] }
  0x71   :  { %v408_v26 = vadd.f32 %v407_v19, %v398_v22  ;;  %v567_v19 = vmul.f32 %v915_v13, %v559_v12  ;;  %v719_v12 = vld [vmem:[#allocation3 + $0x220] sm:$0xff] }
  0x72   :  { %v931_v13 = vld [vmem:[#allocation5 + $0x44] ss:$0 sm:$0xff] }
  0x73   :  { %v418_v30 = vadd.f32 %v417_v23, %v408_v26  ;;  %v577_v23 = vmul.f32 %v916_v17, %v569_v16  ;;  %v729_v16 = vld [vmem:[#allocation3 + $0x228] sm:$0xff]  ;;  %v932_v17 = vld [vmem:[#allocation5 + $0x45] ss:$0 sm:$0xff] }
  0x75   :  { %v428_v34 = vadd.f32 %v427_v27, %v418_v30  ;;  %v587_v27 = vmul.f32 %v917_v21, %v579_v20  ;;  %v739_v20 = vld [vmem:[#allocation3 + $0x230] sm:$0xff]  ;;  %v933_v21 = vld [vmem:[#allocation5 + $0x46] ss:$0 sm:$0xff] }
  0x77   :  { %v438_v38 = vadd.f32 %v437_v31, %v428_v34  ;;  %v597_v31 = vmul.f32 %v918_v25, %v589_v24  ;;  %v749_v24 = vld [vmem:[#allocation3 + $0x238] sm:$0xff]  ;;  %v934_v25 = vld [vmem:[#allocation5 + $0x47] ss:$0 sm:$0xff] }
  0x79   :  { %v448_v42 = vadd.f32 %v447_v35, %v438_v38  ;;  %v607_v35 = vmul.f32 %v919_v29, %v599_v28  ;;  %v759_v28 = vld [vmem:[#allocation3 + $0x240] sm:$0xff]  ;;  %v935_v29 = vld [vmem:[#allocation5 + $0x48] ss:$0 sm:$0xff] }
  0x7b   :  { %v458_v46 = vadd.f32 %v457_v39, %v448_v42  ;;  %v617_v39 = vmul.f32 %v920_v33, %v609_v32  ;;  %v769_v32 = vld [vmem:[#allocation3 + $0x248] sm:$0xff] }
  0x7c   :  { %v936_v33 = vld [vmem:[#allocation5 + $0x49] ss:$0 sm:$0xff] }
  0x7d   :  { %v468_v50 = vadd.f32 %v467_v43, %v458_v46  ;;  %v627_v43 = vmul.f32 %v921_v37, %v619_v36  ;;  %v779_v36 = vld [vmem:[#allocation3 + $0x250] sm:$0xff]  ;;  %v937_v37 = vld [vmem:[#allocation5 + $0x4a] ss:$0 sm:$0xff] }
  0x7f   :  { %v478_v54 = vadd.f32 %v477_v47, %v468_v50  ;;  %v637_v47 = vmul.f32 %v922_v41, %v629_v40  ;;  %v789_v40 = vld [vmem:[#allocation3 + $0x258] sm:$0xff]  ;;  %v938_v41 = vld [vmem:[#allocation5 + $0x4b] ss:$0 sm:$0xff] }
  0x81   :  { %v488_v58 = vadd.f32 %v487_v51, %v478_v54  ;;  %v647_v51 = vmul.f32 %v923_v45, %v639_v44  ;;  %v799_v44 = vld [vmem:[#allocation3 + $0x260] sm:$0xff]  ;;  %v939_v45 = vld [vmem:[#allocation5 + $0x4c] ss:$0 sm:$0xff] }
  0x83   :  { %v498_v62 = vadd.f32 %v497_v55, %v488_v58  ;;  %v657_v55 = vmul.f32 %v924_v49, %v649_v48  ;;  %v809_v48 = vld [vmem:[#allocation3 + $0x268] sm:$0xff] }
  0x84   :  { %v940_v49 = vld [vmem:[#allocation5 + $0x4d] ss:$0 sm:$0xff] }
  0x85   :  { %v508_v2 = vadd.f32 %v507_v59, %v498_v62  ;;  %v667_v59 = vmul.f32 %v925_v53, %v659_v52  ;;  %v819_v52 = vld [vmem:[#allocation3 + $0x270] sm:$0xff]  ;;  %v941_v53 = vld [vmem:[#allocation5 + $0x4e] ss:$0 sm:$0xff] }
  0x87   :  { %v518_v6 = vadd.f32 %v517_v63, %v508_v2  ;;  %v677_v63 = vmul.f32 %v926_v57, %v669_v56  ;;  %v829_v56 = vld [vmem:[#allocation3 + $0x278] sm:$0xff]  ;;  %v942_v57 = vld [vmem:[#allocation5 + $0x4f] ss:$0 sm:$0xff] }
  0x89   :  { %v528_v10 = vadd.f32 %v527_v3, %v518_v6  ;;  %v687_v3 = vmul.f32 %v927_v61, %v679_v60  ;;  %v837_v61 = vmul.f32 %v942_v57, %v829_v56 }
  0x8b   :  { %v538_v14 = vadd.f32 %v537_v7, %v528_v10  ;;  %v697_v7 = vmul.f32 %v928_v1, %v689_v0  ;;  %v943_v0 = vld [vmem:[#allocation2] ss:$0 sm:$0xff] }
  0x8d   :  { %v548_v18 = vadd.f32 %v547_v11, %v538_v14  ;;  %v707_v11 = vmul.f32 %v929_v5, %v699_v4 }
  0x8f   :  { %v558_v22 = vadd.f32 %v557_v15, %v548_v18  ;;  %v717_v15 = vmul.f32 %v930_v9, %v709_v8 }
  0x91   :  { %v568_v26 = vadd.f32 %v567_v19, %v558_v22  ;;  %v727_v19 = vmul.f32 %v931_v13, %v719_v12 }
  0x93   :  { %v578_v30 = vadd.f32 %v577_v23, %v568_v26  ;;  %v737_v23 = vmul.f32 %v932_v17, %v729_v16 }
  0x95   :  { %v588_v34 = vadd.f32 %v587_v27, %v578_v30  ;;  %v747_v27 = vmul.f32 %v933_v21, %v739_v20 }
  0x97   :  { %v598_v38 = vadd.f32 %v597_v31, %v588_v34  ;;  %v757_v31 = vmul.f32 %v934_v25, %v749_v24 }
  0x99   :  { %v608_v42 = vadd.f32 %v607_v35, %v598_v38  ;;  %v767_v35 = vmul.f32 %v935_v29, %v759_v28 }
  0x9b   :  { %v618_v46 = vadd.f32 %v617_v39, %v608_v42  ;;  %v777_v39 = vmul.f32 %v936_v33, %v769_v32 }
  0x9d   :  { %v628_v50 = vadd.f32 %v627_v43, %v618_v46  ;;  %v787_v43 = vmul.f32 %v937_v37, %v779_v36 }
  0x9f   :  { %v638_v54 = vadd.f32 %v637_v47, %v628_v50  ;;  %v797_v47 = vmul.f32 %v938_v41, %v789_v40 }
  0xa1   :  { %v648_v58 = vadd.f32 %v647_v51, %v638_v54  ;;  %v807_v51 = vmul.f32 %v939_v45, %v799_v44 }
  0xa3   :  { %v658_v62 = vadd.f32 %v657_v55, %v648_v58  ;;  %v817_v55 = vmul.f32 %v940_v49, %v809_v48 }
  0xa5   :  { %v668_v2 = vadd.f32 %v667_v59, %v658_v62  ;;  %v827_v59 = vmul.f32 %v941_v53, %v819_v52 }
  0xa7   :  { %v678_v6 = vadd.f32 %v677_v63, %v668_v2 }
  0xa9   :  { %v688_v10 = vadd.f32 %v687_v3, %v678_v6 }
  0xab   :  { %v698_v14 = vadd.f32 %v697_v7, %v688_v10 }
  0xad   :  { %v708_v18 = vadd.f32 %v707_v11, %v698_v14 }
  0xaf   :  { %v718_v22 = vadd.f32 %v717_v15, %v708_v18 }
  0xb1   :  { %v728_v26 = vadd.f32 %v727_v19, %v718_v22 }
  0xb3   :  { %v738_v30 = vadd.f32 %v737_v23, %v728_v26 }
  0xb5   :  { %v748_v34 = vadd.f32 %v747_v27, %v738_v30 }
  0xb7   :  { %v758_v38 = vadd.f32 %v757_v31, %v748_v34 }
  0xb9   :  { %v768_v42 = vadd.f32 %v767_v35, %v758_v38 }
  0xbb   :  { %v778_v46 = vadd.f32 %v777_v39, %v768_v42 }
  0xbd   :  { %v788_v50 = vadd.f32 %v787_v43, %v778_v46 }
  0xbf   :  { %v798_v54 = vadd.f32 %v797_v47, %v788_v50 }
  0xc1   :  { %v808_v58 = vadd.f32 %v807_v51, %v798_v54 }
  0xc3   :  { %v818_v60 = vadd.f32 %v817_v55, %v808_v58 }
  0xc5   :  { %v828_v62 = vadd.f32 %v827_v59, %v818_v60 }
  0xc7   :  { %v838_v63 = vadd.f32 %v837_v61, %v828_v62 }
  0xc9   :  { %839 = vadd.xlane.f32.xlu0 %v838_v63 }
 0x156   :  { %v840_v1 = vpop.xlane.xlu0 %839 }
 0x157   :  { %v848_v2 = vadd.f32 %v943_v0, %v840_v1 }
 0x159   :  { %v944_v3 = vmul.f32 -1.442695, %v848_v2 }
 0x15b   :  { %947 = vpow2.f32 %v944_v3 }
 0x165   :  { %v948_v4 = vpop.eup %947 }
 0x166   :  { %v852_v5 = vadd.f32 1.0, %v948_v4 }
 0x168   :  { %949 = vrcp.f32 %v852_v5 }
 0x172   :  { %v950_v6 = vpop.eup %949 }
 0x173   :  { %856 = vst.msk [vmem:[%s1054_s3] sm:$0xff] %vm855_vm0, %v950_v6 }
 0x174   :  { %861 = vsyncpa [#allocation4], 1 }
 0x175   :  { %862 = vsyncpa [#allocation6], 1 }

</bundles_post_ra>
